<compile_context>
chip_gen: v7x
topology: tpu7x:2x2x1
jax: 0.10.0
libtpu: 0.0.40
codegen_flags: <defaults>
</compile_context>

<pallas_src>
import math
import numpy as np
import jax
import jax.numpy as jnp
from jax.experimental import pallas as pl
from jax.experimental.pallas import tpu as pltpu

LANE = 128                    # pad all feature dims to multiples of the TPU lane width
_VMEM_LIMIT = 48 << 20        # <= v7x's 64 MiB physical VMEM; plenty on v5e/v6e


def _round_up(n, m):
    return ((n + m - 1) // m) * m


def _pad2d(x, rows, cols):
    return jnp.pad(x, ((0, rows - x.shape[0]), (0, cols - x.shape[1])))


def _pad_bias(b, cols):
    b = b.reshape(1, -1)
    return jnp.pad(b, ((0, 0), (0, cols - b.shape[1])))


# --------------------------------------------------------------------------- #
# Kernel 1: fused user+item embedding.
#   One column-partitioned weight (user cols | item cols, biases folded in via
#   indicator columns) lets a single row-tiled matmul produce the whole
#   (n_pad, hp) bf16 emb buffer — no separate calls, no scatter.
# --------------------------------------------------------------------------- #
def _embed_kernel(x_ref, w_ref, o_ref):
    o_ref[...] = jnp.dot(x_ref[...], w_ref[...],
                         preferred_element_type=jnp.float32).astype(o_ref.dtype)


def _embed(x_all, w_emb, *, tm):
    n, fin = x_all.shape
    hp = w_emb.shape[1]
    return pl.pallas_call(
        _embed_kernel,
        out_shape=jax.ShapeDtypeStruct((n, hp), jnp.bfloat16),
        grid_spec=pltpu.PrefetchScalarGridSpec(
            num_scalar_prefetch=0,
            grid=(n // tm,),
            in_specs=[
                pl.BlockSpec((tm, fin), lambda i: (i, 0)),
                pl.BlockSpec((fin, hp), lambda i: (0, 0)),    # resident stacked weight
            ],
            out_specs=pl.BlockSpec((tm, hp), lambda i: (i, 0)),
        ),
        compiler_params=pltpu.CompilerParams(
            dimension_semantics=("parallel",),
            vmem_limit_bytes=_VMEM_LIMIT,
        ),
    )(x_all, w_emb)


# --------------------------------------------------------------------------- #
# Kernel 2: SAGEConv layer
#   h = relu( ((A_counts @ X) * inv_deg) @ Wl + bl + X @ Wr )
#   grid = (row tiles, contraction tiles over A's columns); reduction last.
#   A streams from HBM as int8 counts; X is VMEM-resident bf16; acc is f32.
# --------------------------------------------------------------------------- #
def _sage_kernel(a_ref, inv_ref, x_ref, wl_ref, wr_ref, bl_ref, o_ref, acc_ref):
    i = pl.program_id(0)
    k = pl.program_id(1)
    tm, tk = a_ref.shape

    @pl.when(k == 0)
    def _():
        acc_ref[...] = jnp.zeros_like(acc_ref)

    # bf16 x bf16 MXU-native partial sum.  The int8 A tile is widened on the
    # VPU (hidden under the HBM-bound A DMA); counts are exact in bf16.
    a_bf16 = a_ref[...].astype(jnp.float32).astype(jnp.bfloat16)
    xk = x_ref[pl.ds(pl.multiple_of(k * tk, tk), tk), :]
    acc_ref[...] += jnp.dot(a_bf16, xk, preferred_element_type=jnp.float32)

    @pl.when(k == pl.num_programs(1) - 1)
    def _():
        agg = acc_ref[...] * inv_ref[...]                      # mean = sum / deg (exact f32 scale)
        xr = x_ref[pl.ds(pl.multiple_of(i * tm, tm), tm), :].astype(jnp.float32)
        h = (jnp.dot(agg, wl_ref[...], preferred_element_type=jnp.float32)
             + jnp.dot(xr, wr_ref[...], preferred_element_type=jnp.float32)
             + bl_ref[...])
        o_ref[...] = jnp.maximum(h, 0.0).astype(o_ref.dtype)   # bf16 out == next layer's X


def _sage_layer(a_i8, inv_deg, x_bf16, wl, bl, wr, *, tm, tk):
    n, hp = x_bf16.shape
    flops = 2 * n * n * hp + 4 * n * hp * hp
    bytes_accessed = (n * n                 # A int8
                      + n * hp * 2          # resident X bf16
                      + n * 4               # inv
                      + 2 * hp * hp * 4 + hp * 4
                      + n * hp * 2)         # bf16 output
    return pl.pallas_call(
        _sage_kernel,
        out_shape=jax.ShapeDtypeStruct((n, hp), jnp.bfloat16),
        grid_spec=pltpu.PrefetchScalarGridSpec(
            num_scalar_prefetch=0,
            grid=(n // tm, n // tk),
            in_specs=[
                pl.BlockSpec((tm, tk), lambda i, k: (i, k)),   # A counts (int8, dominant stream)
                pl.BlockSpec((tm, 1), lambda i, k: (i, 0)),    # 1/deg per destination row
                pl.BlockSpec((n, hp), lambda i, k: (0, 0)),    # X resident in VMEM (bf16)
                pl.BlockSpec((hp, hp), lambda i, k: (0, 0)),   # W_l (resident)
                pl.BlockSpec((hp, hp), lambda i, k: (0, 0)),   # W_r (resident)
                pl.BlockSpec((1, hp), lambda i, k: (0, 0)),    # b_l (resident)
            ],
            out_specs=pl.BlockSpec((tm, hp), lambda i, k: (i, 0)),
            scratch_shapes=[pltpu.VMEM((tm, hp), jnp.float32)],
        ),
        compiler_params=pltpu.CompilerParams(
            dimension_semantics=("parallel", "arbitrary"),
            vmem_limit_bytes=_VMEM_LIMIT,
        ),
        cost_estimate=pl.CostEstimate(flops=flops, transcendentals=0,
                                      bytes_accessed=bytes_accessed),
    )(a_i8, inv_deg, x_bf16, wl, wr, bl)


# --------------------------------------------------------------------------- #
# Kernel 3: fused MLP heads over the (virtual) concat of per-layer user feats.
#   cat([f_0, f_1, ...]) @ W1 + b  ==  sum_j f_j @ W1_j + b  (exact split).
#   The three h-branches are packed into one weight / output, the three out_*
#   into one block-diagonal weight / output  ->  two lane-dense output slabs.
# --------------------------------------------------------------------------- #
def _make_head_kernel(n_blocks):
    def head_kernel(*args):
        feat = args[:n_blocks]                                  # bf16 (tm, hp)
        w1 = args[n_blocks:2 * n_blocks]
        bc1, wc2, bc2, wh3, bh3, wo, bo = args[2 * n_blocks:2 * n_blocks + 7]
        h_out, o_out = args[2 * n_blocks + 7:]

        relu = lambda v: jnp.maximum(v, 0.0)

        acc = bc1[...]
        for j in range(n_blocks):
            acc = acc + jnp.dot(feat[j][...].astype(jnp.float32), w1[j][...],
                                preferred_element_type=jnp.float32)
        hidden = relu(acc)                                      # dropout(p=0) == identity
        hidden = relu(jnp.dot(hidden, wc2[...],
                              preferred_element_type=jnp.float32) + bc2[...])
        # packed branches: lanes [0:half]=control, [half:2*half]=treatment, [2*half:3*half]=T
        ht = relu(jnp.dot(hidden, wh3[...],
                          preferred_element_type=jnp.float32) + bh3[...])
        oo = relu(jnp.dot(ht, wo[...],
                          preferred_element_type=jnp.float32) + bo[...])
        h_out[...] = ht.astype(h_out.dtype)
        o_out[...] = oo.astype(o_out.dtype)

    return head_kernel


def _head_mlp(feats, w1_blocks, bc1, wc2, bc2, wh3, bh3, wo, bo, *, tm):
    n_blocks = len(feats)
    nu_pad, hp = feats[0].shape
    h3p = wh3.shape[1]
    o3p = wo.shape[1]

    row = pl.BlockSpec((tm, hp), lambda i: (i, 0))

    def const(shape):
        return pl.BlockSpec(shape, lambda i: (0, 0))

    in_specs = ([row] * n_blocks
                + [const((hp, hp))] * n_blocks
                + [const((1, hp)), const((hp, hp)), const((1, hp)),
                   const((hp, h3p)), const((1, h3p)),
                   const((h3p, o3p)), const((1, o3p))])
    out_specs = (pl.BlockSpec((tm, h3p), lambda i: (i, 0)),
                 pl.BlockSpec((tm, o3p), lambda i: (i, 0)))
    out_shape = (jax.ShapeDtypeStruct((nu_pad, h3p), jnp.float32),
                 jax.ShapeDtypeStruct((nu_pad, o3p), jnp.float32))

    return pl.pallas_call(
        _make_head_kernel(n_blocks),
        out_shape=out_shape,
        grid_spec=pltpu.PrefetchScalarGridSpec(
            num_scalar_prefetch=0,
            grid=(nu_pad // tm,),
            in_specs=in_specs,
            out_specs=out_specs,
        ),
        compiler_params=pltpu.CompilerParams(
            dimension_semantics=("parallel",),
            vmem_limit_bytes=_VMEM_LIMIT,
        ),
    )(*feats, *w1_blocks, bc1, wc2, bc2, wh3, bh3, wo, bo)


# --------------------------------------------------------------------------- #
# Plain-JAX glue: int8 edge-count adjacency (padded node-index space) + 1/deg.
# --------------------------------------------------------------------------- #
def build_adjacency(edge_index, nu, nu_pad, n_pad):
    src, dst = edge_index[0], edge_index[1]
    remap = lambda v: jnp.where(v < nu, v, v - nu + nu_pad)
    src_p, dst_p = remap(src), remap(dst)
    counts = jnp.zeros((n_pad, n_pad), jnp.float32).at[dst_p, src_p].add(1.0)
    deg = counts.sum(axis=1)
    inv = jnp.where(deg > 0, 1.0 / deg, 0.0).reshape(n_pad, 1)
    return counts.astype(jnp.int8), inv


# --------------------------------------------------------------------------- #
# Full forward
# --------------------------------------------------------------------------- #
def bipartite_dragnn_forward(xu, xp, edge_index, params, *, tm=128, tk=128):
    nu, nfeat = xu.shape
    n_items, nproduct = xp.shape
    hidden = params["user_embed_w"].shape[1]
    half = hidden // 2
    out_ch = params["out_control_w"].shape[1]
    num_layers = len(params["convs"])

    # padded sizes: lane dims -> multiples of 128, row dims -> tile multiples
    hp = _round_up(hidden, LANE)
    h3p = _round_up(3 * half, LANE)
    o3p = _round_up(3 * out_ch, LANE)
    nu_pad = _round_up(nu, tm)
    np_pad = _round_up(n_items, tm)
    n_pad = _round_up(nu_pad + np_pad, math.lcm(tm, tk))

    # 1) fused user+item embedding -> emb (n_pad, hp) in bf16.
    #    Column-partitioned stacked weight; biases folded in via indicator cols.
    fhalf = _round_up(max(nfeat, nproduct) + 1, LANE)
    fin = 2 * fhalf
    x_all = jnp.zeros((n_pad, fin), jnp.float32)
    x_all = x_all.at[:nu, :nfeat].set(xu)
    x_all = x_all.at[:nu, nfeat].set(1.0)
    x_all = x_all.at[nu_pad:nu_pad + n_items, fhalf:fhalf + nproduct].set(xp)
    x_all = x_all.at[nu_pad:nu_pad + n_items, fhalf + nproduct].set(1.0)

    w_emb = jnp.zeros((fin, hp), jnp.float32)
    w_emb = w_emb.at[:nfeat, :hidden].set(params["user_embed_w"])
    w_emb = w_emb.at[nfeat, :hidden].set(params["user_embed_b"])
    w_emb = w_emb.at[fhalf:fhalf + nproduct, :hidden].set(params["item_embed_w"])
    w_emb = w_emb.at[fhalf + nproduct, :hidden].set(params["item_embed_b"])

    emb = _embed(x_all, w_emb, tm=tm)                          # (n_pad, hp) bf16

    # 2) SAGEConv stack over the bipartite graph (int8 counts + f32 1/deg)
    a_i8, inv_deg = build_adjacency(edge_index, nu, nu_pad, n_pad)
    user_feats = [emb[:nu_pad]]
    for layer in params["convs"]:
        emb = _sage_layer(a_i8, inv_deg, emb,
                          _pad2d(layer["lin_l_w"], hp, hp),
                          _pad_bias(layer["lin_l_b"], hp),
                          _pad2d(layer["lin_r_w"], hp, hp),
                          tm=tm, tk=tk)
        user_feats.append(emb[:nu_pad])

    # 3) MLP heads: block-split concat weight, packed branch / output weights
    w1_full = params["hidden_common1_w"]                       # ((1+L)*hidden, hidden)
    w1_blocks = [_pad2d(w1_full[j * hidden:(j + 1) * hidden], hp, hp)
                 for j in range(1 + num_layers)]

    wh3 = jnp.zeros((hp, h3p), jnp.float32)
    wh3 = wh3.at[:hidden, 0:half].set(params["hidden_control_w"])
    wh3 = wh3.at[:hidden, half:2 * half].set(params["hidden_treatment_w"])
    wh3 = wh3.at[:hidden, 2 * half:3 * half].set(params["hidden_T_w"])
    bh3 = jnp.zeros((1, h3p), jnp.float32)
    bh3 = bh3.at[0, 0:half].set(params["hidden_control_b"])
    bh3 = bh3.at[0, half:2 * half].set(params["hidden_treatment_b"])
    bh3 = bh3.at[0, 2 * half:3 * half].set(params["hidden_T_b"])

    wo = jnp.zeros((h3p, o3p), jnp.float32)
    wo = wo.at[0:half, 0:out_ch].set(params["out_control_w"])
    wo = wo.at[half:2 * half, out_ch:2 * out_ch].set(params["out_treatment_w"])
    wo = wo.at[2 * half:3 * half, 2 * out_ch:3 * out_ch].set(params["out_T_w"])
    bo = jnp.zeros((1, o3p), jnp.float32)
    bo = bo.at[0, 0:out_ch].set(params["out_control_b"])
    bo = bo.at[0, out_ch:2 * out_ch].set(params["out_treatment_b"])
    bo = bo.at[0, 2 * out_ch:3 * out_ch].set(params["out_T_b"])

    h_pack, o_pack = _head_mlp(
        user_feats, w1_blocks,
        _pad_bias(params["hidden_common1_b"], hp),
        _pad2d(params["hidden_common2_w"], hp, hp),
        _pad_bias(params["hidden_common2_b"], hp),
        wh3, bh3, wo, bo,
        tm=min(tm, 128))                                       # cap head tm: vreg pressure

    o_t0 = o_pack[:nu, 0:out_ch]
    o_t1 = o_pack[:nu, out_ch:2 * out_ch]
    o_T = o_pack[:nu, 2 * out_ch:3 * out_ch]
    h_t0 = h_pack[:nu, 0:half]
    h_t1 = h_pack[:nu, half:2 * half]
    return o_t1, o_t0, o_T, h_t1, h_t0


# --------------------------------------------------------------------------- #
# Pure-JAX reference: same math, unpadded.  It applies the same bf16 rounding
# of the node embeddings the kernel uses (A counts stay exact); residual
# mismatch vs the kernel comes only from rare bf16 cast-boundary flips on
# nearly-equal f32 values, hence the loosened tolerance in __main__.
# --------------------------------------------------------------------------- #
def reference_forward(xu, xp, edge_index, params):
    nu = xu.shape[0]
    n = nu + xp.shape[0]
    src, dst = edge_index[0], edge_index[1]
    counts = jnp.zeros((n, n), jnp.float32).at[dst, src].add(1.0)
    deg = counts.sum(axis=1)
    inv = jnp.where(deg > 0, 1.0 / deg, 0.0)

    relu = lambda v: jnp.maximum(v, 0.0)
    to_bf16 = lambda v: v.astype(jnp.bfloat16)

    xu_e = to_bf16(xu @ params["user_embed_w"] + params["user_embed_b"])
    xp_e = to_bf16(xp @ params["item_embed_w"] + params["item_embed_b"])
    emb = jnp.concatenate([xu_e, xp_e], axis=0)                # bf16, like kernel storage
    feats = [xu_e]
    for layer in params["convs"]:
        x32 = emb.astype(jnp.float32)
        agg = (counts @ x32) * inv[:, None]                    # sum-then-scale == kernel order
        h = agg @ layer["lin_l_w"] + layer["lin_l_b"] + x32 @ layer["lin_r_w"]
        emb = to_bf16(relu(h))
        feats.append(emb[:nu])
    cat = jnp.concatenate(feats, axis=1).astype(jnp.float32)
    hidden = relu(cat @ params["hidden_common1_w"] + params["hidden_common1_b"])
    hidden = relu(hidden @ params["hidden_common2_w"] + params["hidden_common2_b"])
    ht0 = relu(hidden @ params["hidden_control_w"] + params["hidden_control_b"])
    ht1 = relu(hidden @ params["hidden_treatment_w"] + params["hidden_treatment_b"])
    hT = relu(hidden @ params["hidden_T_w"] + params["hidden_T_b"])
    o_t0 = relu(ht0 @ params["out_control_w"] + params["out_control_b"])
    o_t1 = relu(ht1 @ params["out_treatment_w"] + params["out_treatment_b"])
    o_T = relu(hT @ params["out_T_w"] + params["out_T_b"])
    return o_t1, o_t0, o_T, ht1, ht0


def init_params(key, nfeat, nproduct, hidden, out_channels, num_layers):
    def glorot(k, shape):
        fan_in, fan_out = shape
        limit = jnp.sqrt(6.0 / (fan_in + fan_out))
        return jax.random.uniform(k, shape, jnp.float32, -limit, limit)

    keys = iter(jax.random.split(key, 64))
    half = hidden // 2

    def lin(fin, fout):
        return (glorot(next(keys), (fin, fout)),
                jax.random.normal(next(keys), (fout,), jnp.float32) * 0.02)

    p = {}
    p["user_embed_w"], p["user_embed_b"] = lin(nfeat, hidden)
    p["item_embed_w"], p["item_embed_b"] = lin(nproduct, hidden)
    p["convs"] = []
    for _ in range(num_layers):
        wl, bl = lin(hidden, hidden)
        wr = glorot(next(keys), (hidden, hidden))
        p["convs"].append({"lin_l_w": wl, "lin_l_b": bl, "lin_r_w": wr})
    p["hidden_common1_w"], p["hidden_common1_b"] = lin((1 + num_layers) * hidden, hidden)
    p["hidden_common2_w"], p["hidden_common2_b"] = lin(hidden, hidden)
    p["hidden_control_w"], p["hidden_control_b"] = lin(hidden, half)
    p["hidden_treatment_w"], p["hidden_treatment_b"] = lin(hidden, half)
    p["hidden_T_w"], p["hidden_T_b"] = lin(hidden, half)
    p["out_control_w"], p["out_control_b"] = lin(half, out_channels)
    p["out_treatment_w"], p["out_treatment_b"] = lin(half, out_channels)
    p["out_T_w"], p["out_T_b"] = lin(half, out_channels)
    return p


if __name__ == "__main__":
    # Make the reference's f32 matmuls match the in-kernel f32 accumulation as
    # closely as possible.
    jax.config.update("jax_default_matmul_precision", "highest")

    NU, N_ITEMS = 128, 128
    NFEAT, NPRODUCT = 16, 24
    HIDDEN = 32
    OUT_CHANNELS = 2
    NUM_LAYERS = 2

    key = jax.random.PRNGKey(0)
    k_params, k_xu, k_xp = jax.random.split(key, 3)
    params = init_params(k_params, NFEAT, NPRODUCT, HIDDEN, OUT_CHANNELS, NUM_LAYERS)
    xu = jax.random.normal(k_xu, (NU, NFEAT), jnp.float32)
    xp = jax.random.normal(k_xp, (N_ITEMS, NPRODUCT), jnp.float32)

    # Deterministic bipartite graph: user u <-> items (u % P) and ((3u+7) % P),
    # edges in both directions, combined indexing (users first, then items).
    u = np.arange(NU, dtype=np.int32)
    i1 = u % N_ITEMS
    i2 = (3 * u + 7) % N_ITEMS
    src = np.concatenate([u, u, NU + i1, NU + i2])
    dst = np.concatenate([NU + i1, NU + i2, u, u])
    edge_index = jnp.asarray(np.stack([src, dst], axis=0), dtype=jnp.int32)

    outs = bipartite_dragnn_forward(xu, xp, edge_index, params, tm=128, tk=128)
    outs = jax.block_until_ready(outs)

    refs = reference_forward(xu, xp, edge_index, params)
    names = ["out_2t1", "out_2t0", "out_2T", "hidden_1t1", "hidden_1t0"]
    # Tolerance accounts for bf16 node-embedding storage (both sides round at
    # the same points; only rare one-ulp cast-boundary flips differ).
    for name, got, want in zip(names, outs, refs):
        assert got.shape == want.shape, (name, got.shape, want.shape)
        np.testing.assert_allclose(np.asarray(got), np.asarray(want),
                                   rtol=2e-2, atol=2e-2, err_msg=name)

    print("KERNEL_OK")
</pallas_src>

<mosaic_0001>
module attributes {stable_mosaic.version = 11 : i64} {
  func.func @_embed_kernel(%arg0: i32, %arg1: memref<128x256xf32, #tpu.memory_space<vmem>>, %arg2: memref<256x128xf32, #tpu.memory_space<vmem>>, %arg3: memref<128x128xbf16, #tpu.memory_space<vmem>>) attributes {dimension_semantics = [#tpu.dimension_semantics<parallel>], iteration_bounds = array<i64: 2>, scalar_prefetch = 0 : i64, scratch_operands = 0 : i64, tpu.core_type = #tpu.core_type<tc>, window_params = [{transform_indices = @transform_0, window_bounds = array<i64: 128, 256>}, {pipeline_mode = #tpu.pipeline_mode<synchronous>, transform_indices = @transform_1, window_bounds = array<i64: 256, 128>}, {transform_indices = @transform_2, window_bounds = array<i64: 128, 128>}]} {
    %c0 = arith.constant 0 : index
    %c0_0 = arith.constant 0 : index
    %0 = vector.load %arg1[%c0, %c0_0] : memref<128x256xf32, #tpu.memory_space<vmem>>, vector<128x256xf32>
    %c0_1 = arith.constant 0 : index
    %c0_2 = arith.constant 0 : index
    %1 = vector.load %arg2[%c0_1, %c0_2] : memref<256x128xf32, #tpu.memory_space<vmem>>, vector<256x128xf32>
    %cst = arith.constant dense<0.000000e+00> : vector<128x128xf32>
    %2 = tpu.matmul %0, %1, %cst {dimension_numbers = #tpu.dot_dimension_numbers<[1], [0], [0], [1], [0, 0, 1, 1], [], []>, precision = #tpu.contract_precision<fp32>} : vector<128x256xf32>, vector<256x128xf32>, vector<128x128xf32> -> vector<128x128xf32>
    %3 = arith.truncf %2 : vector<128x128xf32> to vector<128x128xbf16>
    %c0_3 = arith.constant 0 : index
    %c0_4 = arith.constant 0 : index
    %4 = vector.load %arg3[%c0_3, %c0_4] : memref<128x128xbf16, #tpu.memory_space<vmem>>, vector<128x128xbf16>
    tpu.vector_store %arg3[%c0_3, %c0_4], %3 {strides = array<i32>} : memref<128x128xbf16, #tpu.memory_space<vmem>>, vector<128x128xbf16>,
    return
  }
  func.func @transform_0(%arg0: i32) -> (i32, i32) {
    %c0_i32 = arith.constant 0 : i32
    %c0_i32_0 = arith.constant 0 : i32
    return %arg0, %c0_i32 : i32, i32
  }
  func.func @transform_1(%arg0: i32) -> (i32, i32) {
    %c0_i32 = arith.constant 0 : i32
    %c0_i32_0 = arith.constant 0 : i32
    %c0_i32_1 = arith.constant 0 : i32
    return %c0_i32, %c0_i32_0 : i32, i32
  }
  func.func @transform_2(%arg0: i32) -> (i32, i32) {
    %c0_i32 = arith.constant 0 : i32
    %c0_i32_0 = arith.constant 0 : i32
    return %arg0, %c0_i32 : i32, i32
  }
}

</mosaic_0001>

<bundles_post_ra>
// kernel: tpu_custom_call.1
= control target key start
LH: loop header
LB: loop body
LE: loop exit
PB: predicated region body
PF: predicated region fallthrough
CT: control target
= control target key end

     0   :  { %7 = vsyncpa [#allocation3], 0  ;;  %s4326_s0 = inlined_call_operand.hbm [shape: f32[256,256], index: 0, kind: input, shape index: {}]   ;;  %s4327_s1 = inlined_call_operand.hbm [shape: f32[256,128], index: 1, kind: input, shape index: {}]   ;;  %s4328_s2 = inlined_call_operand.hbm [shape: bf16[256,128], index: 2, kind: output, shape index: {}]  }
   0x1   :  { %9 = vsyncpa [#allocation3 + $0x1], 0 }
   0x2   :  { %10 = vsyncpa [#allocation6], 0 }
   0x3   :  { %11 = vsyncpa [#allocation4], 0 }
   0x4   :  { %13 = vsyncpa [#allocation4 + $0x1], 0  ;;  %s3111_s9 = smov 0   ;;  %s3113_s10 = smov 0  }
   0x5   :  { %s3115_s11 = smov 0   ;;  %s3117_s12 = smov 0  }
   0x6 LB: > { %s3132_s13 = sadd.s32 4294967295, %s3085_s12   ;;  %s2123_s14 = sadd.s32 4294967294, %s3085_s12   ;;  %s3085_s12 = sphi %s3117_s12, %s4724_s12   ;;  %s3081_s11 = sphi %s3115_s11, %s4723_s11   ;;  %s3077_s10 = sphi %s3113_s10, %s4722_s10   ;;  %s3073_s9 = sphi %s3111_s9, %s4721_s9  }
   0x7   : > { %p39_p0 = scmp.ne.s32.totalorder %s3077_s10, %s3073_s9  ;;  %p4329_p1 = scmp.eq.s32.totalorder %s3132_s13, 0 }
   0x8   : > { %p90_p3 = scmp.eq.s32.totalorder %s2123_s14, 1  ;;  %p2124_p5 = scmp.ge.s32.totalorder %s3085_s12, 1 }
   0x9   : > { %p3141_p4 = por %p4329_p1, %p39_p0  ;;  %p97_p7 = scmp.lt.s32.totalorder %s3085_s12, 3 }
   0xa   : > { %p3146_p6 = por %p90_p3, %p39_p0  ;;  %s3087_s18 = smov [#allocation5]  }
   0xb   : > { %s4489_s15 = scalar_select %p3141_p4, 1, 0 }
   0xc   : > { %s4490_s16 = scalar_select %p3146_p6, 1, 0 }
   0xd   : > { %p3151_p8 = pnand %p2124_p5, %p97_p7  ;;  %s109_s19 = sshll.u32 %s3087_s18, 4  ;;  %s3155_s19 = int_to_ptr.vmem [resolvable:$true] %s109_s19 }
   0xe   : > { %s3167_s21 = sadd.s32 1, %s3085_s12   ;;  %s26_s22 = sadd.s32 1, %s3081_s11 }
   0xf   : > { %s4491_s17 = scalar_select %p3151_p8, 1, 0 }
  0x10   : > { %p2902_p9 = pneg %p3151_p8  ;;  %s23_s23 = ssub.s32 %s3085_s12, %s3167_s21 }
  0x11   : > { %s2957_s26 = scalar_lea.hbm %s4327_s1, 4096 }
  0x12   : > { %p3162_p11 = pnand %p2902_p9, %p4329_p1  ;;  %p2958_p12 = scmp.ne.s32.totalorder %s4327_s1, %s2957_s26 }
  0x13   : > { %p2964_p5 = scmp.lt.u32.totalorder %s2957_s26, %s4327_s1 }
  0x14   : > { %p2959_p13 = pneg %p3162_p11 }
  0x16   : > { %p2960_p0 = pnand %p2959_p13, %p2958_p12 }
  0x18   : > { %p2961_p3 = pneg %p2960_p0 }
  0x1a   : > { %p2966_p7 = pnand %p2964_p5, %p2961_p3 }
  0x1c   : > { %2969 = shalt.err (!%p2966_p7)
}
  0x1d   : > { %s2970_s3 = scalar_lea.vmem %s3155_s19, 4096  ;;  %p2978_p2 = scmp.lt.s32.totalorder %s3155_s19, %s3155_s19 }
  0x1e   : > { %p2971_p9 = scmp.ne.s32.totalorder %s3155_s19, %s2970_s3  ;;  %p2979_p6 = scmp.lt.s32.totalorder %s2970_s3, %s2970_s3 }
  0x20   : > { %p2973_p10 = pnand %p2971_p9, %p2959_p13  ;;  %p2980_p4 = por %p2979_p6, %p2978_p2 }
  0x22   : > { %p2974_p1 = pneg %p2973_p10 }
  0x24   : > { %p2981_p8 = pnand %p2980_p4, %p2974_p1 }
  0x26   : > { %2984 = shalt.err (!%p2981_p8)
}
  0x27   : > { %s3088_s4 = smov 128   ;;  %s3089_s5 = smov 8  }
  0x28   : > { %2905 = dma.hbm_to_vmem [thread:$0]  (!%p3162_p11), %s4327_s1, 4096, %s3155_s19, [#allocation6], %s3088_s4, %s3088_s4, %s3089_s5  }
  0x29   : > { %p24_p2 = scmp.eq.s32.totalorder %s23_s23, 0  ;;  %p33_p1 = scmp.ne.s32.totalorder %s3081_s11, %s3077_s10 }
  0x2a   : > { %p34_p4 = scmp.eq.s32.totalorder %s3085_s12, 0  ;;  %p2915_p6 = scmp.lt.s32.totalorder %s3085_s12, 2 }
  0x2b   : > { %s3198_s8 = scalar_select %p24_p2, %s3081_s11, %s26_s22  }
  0x2c   : > { %p35_p8 = por %p34_p4, %p33_p1  ;;  %p4493_p10 = scmp.eq.s32.totalorder %s3132_s13, 1 }
  0x2d   : > { %s123_s18 = sand.u32 1, %s3081_s11   ;;  %s2157_s24 = sshll.u32 %s3085_s12, 12 }
  0x2e   : > { %p3202_p12 = por %p4493_p10, %p33_p1  ;;  %s2127_s25 = sshll.u32 %s123_s18, 8 }
  0x2f   : > { %s3211_s27 = scalar_lea.hbm %s4326_s0, %s2157_s24  ;;  %s127_s19 = scalar_lea.vmem [#allocation2], %s2127_s25 }
  0x30   : > { %s135_s22 = sshll.u32 %s127_s19, 4  ;;  %p3213_p11 = pnand %p2915_p6, %p35_p8  ;;  %s3217_s22 = int_to_ptr.vmem [resolvable:$true] %s135_s22 }
  0x31   : > { %s3219_s28 = scalar_lea.sflag [#allocation3], %s123_s18  ;;  %s2985_s29 = scalar_lea.hbm %s3211_s27, 4096 }
  0x32   : > { %p2986_p13 = scmp.ne.s32.totalorder %s3211_s27, %s2985_s29  ;;  %p2987_p0 = pneg %p3213_p11 }
  0x33   : > { %s2990_s4 = scalar_lea.hbm %s4326_s0, 8192  ;;  %p2991_p7 = scmp.lt.u32.totalorder %s3211_s27, %s4326_s0 }
  0x34   : > { %p2988_p3 = pnand %p2987_p0, %p2986_p13  ;;  %p2992_p9 = scmp.lt.u32.totalorder %s2990_s4, %s2985_s29 }
  0x35   : > { %p2994_p1 = scmp.lt.u32.totalorder %s2985_s29, %s3211_s27 }
  0x36   : > { %p2989_p5 = pneg %p2988_p3  ;;  %p2993_p2 = por %p2992_p9, %p2991_p7 }
  0x38   : > { %p2995_p4 = por %p2994_p1, %p2993_p2 }
  0x3a   : > { %p2996_p6 = pnand %p2995_p4, %p2989_p5 }
  0x3c   : > { %2999 = shalt.err (!%p2996_p6)
}
  0x3d   : > { %s3000_s7 = scalar_lea.vmem %s3217_s22, 4096  ;;  %s3090_s18 = smov [#allocation2]  }
  0x3e   : > { %p3001_p8 = scmp.ne.s32.totalorder %s3217_s22, %s3000_s7  ;;  %s3005_s24 = sshll.u32 %s3090_s18, 4  ;;  %s3006_s24 = int_to_ptr.vmem [resolvable:$false] %s3005_s24 }
  0x3f   : > { %s3007_s25 = scalar_lea.vmem %s3006_s24, 8192  ;;  %p3008_p3 = scmp.lt.s32.totalorder %s3217_s22, %s3006_s24 }
  0x40   : > { %p3003_p10 = pnand %p3001_p8, %p2987_p0  ;;  %p3009_p7 = scmp.lt.s32.totalorder %s3007_s25, %s3000_s7 }
  0x42   : > { %p3004_p13 = pneg %p3003_p10  ;;  %p3010_p9 = por %p3009_p7, %p3008_p3 }
  0x44   : > { %p3011_p2 = pnand %p3010_p9, %p3004_p13 }
  0x46   : > { %3014 = shalt.err (!%p3011_p2)
}
  0x47   : > { %s3091_s20 = smov 256   ;;  %s3092_s26 = smov 16  }
  0x48   : > { %2909 = dma.hbm_to_vmem [thread:$0]  (!%p3213_p11), %s3211_s27, 4096, %s3217_s22, %s3219_s28, %s3091_s20, %s3091_s20, %s3092_s26  }
  0x49   : > { %p4496_p0 = scmp.ne.s32.totalorder %s4491_s17, 0 }
  0x4b   : > { %147 = sbr.rel (%p4496_p0) target bundleno = 575 (0x23f), region = 28 }
  0x52   : > { %s3250_s19 = sand.u32 1, %s3077_s10   ;;  %p4497_p5 = scmp.ne.s32.totalorder %s4489_s15, 0 }
  0x53   : > { %s2132_s29 = sshll.u32 %s3250_s19, 8  ;;  %s150_s30 = scalar_lea.sflag [#allocation3], %s3250_s19 }
  0x54   : > { %s3254_s3 = scalar_lea.vmem [#allocation2], %s2132_s29 }
  0x55   : > { %3060 = dma.done.wait (%p4497_p5), %s150_s30, 4096  }
  0x56   : > { %3062 = vsyncadd (%p4497_p5), %s150_s30, 4294963200  ;;  %p4498_p11 = scmp.eq.s32.totalorder %s3132_s13, 0 }
  0x58   : > { %3064 = dma.done.wait (%p4498_p11), [#allocation6], 4096   ;;  %p4499_p1 = pmov %p4498_p11 }
  0x59   : > { %v228_v0 = vld [vmem:[#allocation5 + $0x80] sm:$0xff]  ;;  %v229_v1 = vld [vmem:[#allocation5 + $0x88] sm:$0xff]  ;;  %v230_v7 = vld [vmem:[#allocation5 + $0x90] sm:$0xff]  ;;  %s2134_s15 = sshll.u32 %s3250_s19, 6  ;;  %s2174_s27 = sshll.u32 %s3132_s13, 10 }
  0x5a   : > { %3066 = vsyncadd (%p4499_p1), [#allocation6], 4294963200  ;;  %v212_v2 = vld [vmem:[#allocation5] sm:$0xff]  ;;  %v293_v3 = vand.u32 4294901760, %v228_v0  ;;  %v296_v4 = vand.u32 4294901760, %v229_v1  ;;  %v213_v5 = vld [vmem:[#allocation5 + $0x8] sm:$0xff]  ;;  %s4279_s4 = scalar_lea.hbm %s4328_s2, %s2174_s27 }
  0x5b   : > { %v245_v6 = vand.u32 4294901760, %v212_v2  ;;  %v231_v8 = vld [vmem:[#allocation5 + $0x98] sm:$0xff]  ;;  %v248_v9 = vand.u32 4294901760, %v213_v5  ;;  %v299_v10 = vand.u32 4294901760, %v230_v7  ;;  %v214_v12 = vld [vmem:[#allocation5 + $0x10] sm:$0xff]  ;;  %v232_v18 = vld [vmem:[#allocation5 + $0xa0] sm:$0xff] }
  0x5c   : > { %v302_v11 = vand.u32 4294901760, %v231_v8  ;;  %v215_v13 = vld [vmem:[#allocation5 + $0x18] sm:$0xff]  ;;  %v3264_v14 = vpack.c.bf16 %v296_v4, %v293_v3  ;;  %v251_v16 = vand.u32 4294901760, %v214_v12  ;;  %v233_v19 = vld [vmem:[#allocation5 + $0xa8] sm:$0xff]  ;;  %v216_v24 = vld [vmem:[#allocation5 + $0x20] sm:$0xff]  ;;  %v305_v30 = vand.u32 4294901760, %v232_v18 }
  0x5d   : > { %v3266_v15 = vsub.f32 %v212_v2, %v245_v6  ;;  %v254_v17 = vand.u32 4294901760, %v215_v13  ;;  %v3268_v20 = vpack.c.bf16 %v248_v9, %v245_v6  ;;  %v3270_v21 = vsub.f32 %v213_v5, %v248_v9  ;;  %v217_v25 = vld [vmem:[#allocation5 + $0x28] sm:$0xff]  ;;  %v234_v38 = vld [vmem:[#allocation5 + $0xb0] sm:$0xff]  ;;  %v235_v43 = vld [vmem:[#allocation5 + $0xb8] sm:$0xff]  ;;  %s4253_s17 = scalar_lea.vmem [#allocation7], %s2134_s15  ;;  %s2027_s5 = scalar_lea.sflag [#allocation4], %s3250_s19 }
  0x5e   : > { %v3272_v22 = vpack.c.bf16 %v302_v11, %v299_v10  ;;  %v3274_v23 = vsub.f32 %v230_v7, %v299_v10  ;;  %2703 = vmatprep.subr.bf16.mxu0 %v3264_v14  ;;  %v3277_v26 = vsub.f32 %v231_v8, %v302_v11  ;;  %v3281_v28 = vsub.f32 %v214_v12, %v251_v16  ;;  %v218_v56 = vld [vmem:[#allocation5 + $0x30] sm:$0xff]  ;;  %v219_v57 = vld [vmem:[#allocation5 + $0x38] sm:$0xff]  ;;  %v236_v6 = vld [vmem:[#allocation5 + $0xc0] sm:$0xff]  ;;  %s2040_s22 = sshll.u32 %s4253_s17, 4  ;;  %s3093_s13 = smov [#allocation7]   ;;  %s4281_s22 = int_to_ptr.vmem [resolvable:$true] %s2040_s22 }
  0x5f   : > { %4500 = vst [vmem:[#allocation11_spill] sm:$0xff] %v3268_v20  ;;  %4501 = vst [vmem:[#allocation12_spill] sm:$0xff] %v3270_v21  ;;  %v3279_v27 = vpack.c.bf16 %v254_v17, %v251_v16  ;;  %v3283_v29 = vsub.f32 %v215_v13, %v254_v17  ;;  %2705 = vmatpush3.bf16.msra.mxu0 %v3268_v20  ;;  %v308_v31 = vand.u32 4294901760, %v233_v19  ;;  %v257_v34 = vand.u32 4294901760, %v216_v24  ;;  %v237_v7 = vld [vmem:[#allocation5 + $0xc8] sm:$0xff]  ;;  %v220_v12 = vld [vmem:[#allocation5 + $0x40] sm:$0xff] }
  0x60   : > { %4502 = vst [vmem:[#allocation13_spill] sm:$0xff] %v3272_v22  ;;  %4503 = vst [vmem:[#allocation14_spill] sm:$0xff] %v3274_v23  ;;  %v3286_v32 = vsub.f32 %v228_v0, %v293_v3  ;;  %v3288_v33 = vsub.f32 %v229_v1, %v296_v4  ;;  %2707 = vmatprep.subr.bf16.mxu0 %v3272_v22  ;;  %v260_v35 = vand.u32 4294901760, %v217_v25  ;;  %v4345_v36 = vand.u32 4294901760, %v3266_v15  ;;  %s3015_s6 = scalar_lea.vmem %s4281_s22, 1024  ;;  %s3019_s7 = sshll.u32 %s3093_s13, 4  ;;  %s3020_s7 = int_to_ptr.vmem [resolvable:$false] %s3019_s7 }
  0x61   : > { %4504 = vst [vmem:[#allocation15_spill] sm:$0xff] %v3277_v26  ;;  %4505 = vst [vmem:[#allocation16_spill] sm:$0xff] %v3279_v27  ;;  %v4344_v37 = vand.u32 4294901760, %v3270_v21  ;;  %v3293_v39 = vpack.c.bf16 %v308_v31, %v305_v30  ;;  %v3295_v40 = vsub.f32 %v232_v18, %v305_v30  ;;  %v3297_v41 = vsub.f32 %v233_v19, %v308_v31  ;;  %v221_v31 = vld [vmem:[#allocation5 + $0x48] sm:$0xff]  ;;  %p3016_p4 = scmp.ne.s32.totalorder %s4281_s22, %s3015_s6  ;;  %s3021_s18 = scalar_lea.vmem %s3020_s7, 2048 }
  0x62   : > { %4506 = vst [vmem:[#allocation17_spill] sm:$0xff] %v3286_v32  ;;  %4507 = vst [vmem:[#allocation18_spill] sm:$0xff] %v3288_v33  ;;  %v4351_v42 = vand.u32 4294901760, %v3286_v32  ;;  %v4350_v44 = vand.u32 4294901760, %v3288_v33  ;;  %v3301_v45 = vpack.c.bf16 %v260_v35, %v257_v34  ;;  %v3303_v46 = vsub.f32 %v216_v24, %v257_v34  ;;  %p3022_p10 = scmp.lt.s32.totalorder %s4281_s22, %s3020_s7  ;;  %p3023_p13 = scmp.lt.s32.totalorder %s3021_s18, %s3015_s6 }
  0x63   : > { %4508 = vst [vmem:[#allocation19_spill] sm:$0xff] %v3293_v39  ;;  %4509 = vst [vmem:[#allocation20_spill] sm:$0xff] %v3297_v41  ;;  %v3305_v47 = vsub.f32 %v217_v25, %v260_v35  ;;  %2709 = vmatpush3.bf16.msra.mxu0 %v3279_v27  ;;  %v585_v49 = vsub.f32 %v3266_v15, %v4345_v36  ;;  %v592_v50 = vsub.f32 %v3270_v21, %v4344_v37  ;;  %v227_v36 = vld [vmem:[#allocation5 + $0x78] sm:$0xff]  ;;  %p3017_p6 = pnand %p3016_p4, %p3202_p12 }
  0x64   : > { %4510 = vst [vmem:[#allocation21_spill] sm:$0xff] %v3301_v45  ;;  %v697_v48 = vsub.f32 %v3286_v32, %v4351_v42  ;;  %v311_v51 = vand.u32 4294901760, %v234_v38  ;;  %2711 = vmatprep.subr.bf16.mxu0 %v3293_v39  ;;  %v704_v52 = vsub.f32 %v3288_v33, %v4350_v44  ;;  %v314_v53 = vand.u32 4294901760, %v235_v43  ;;  %v181_v44 = vld [vmem:[%s3254_s3 + $0x8] sm:$0xff]  ;;  %v180_v42 = vld [vmem:[%s3254_s3] sm:$0xff]  ;;  %p3024_p3 = por %p3023_p13, %p3022_p10 }
  0x65   : > { %v4343_v54 = vand.u32 4294901760, %v3274_v23  ;;  %v4342_v55 = vand.u32 4294901760, %v3277_v26  ;;  %v586_v59 = vand.u32 4294901760, %v585_v49  ;;  %v593_v60 = vand.u32 4294901760, %v592_v50  ;;  %p3018_p8 = pneg %p3017_p6 }
  0x66   : > { %v698_v58 = vand.u32 4294901760, %v697_v48  ;;  %v3323_v61 = vsub.f32 %v234_v38, %v311_v51  ;;  %v705_v62 = vand.u32 4294901760, %v704_v52  ;;  %v3325_v63 = vpack.c.bf16 %v314_v53, %v311_v51 }
  0x67   : > { %v3327_v0 = vsub.f32 %v235_v43, %v314_v53  ;;  %v711_v1 = vsub.f32 %v3274_v23, %v4343_v54  ;;  %2713 = vmatpush3.bf16.msra.mxu0 %v3301_v45  ;;  %v2736_v2 = vpack.c.bf16 %v593_v60, %v586_v59  ;;  %v718_v3 = vsub.f32 %v3277_v26, %v4342_v55  ;;  %v239_v59 = vld [vmem:[#allocation5 + $0xd8] sm:$0xff]  ;;  %p3025_p7 = pnand %p3024_p3, %p3018_p8 }
  0x68   : > { %4511 = vst [vmem:[#allocation22_spill] sm:$0xff] %v3323_v61  ;;  %4512 = vst [vmem:[#allocation23_spill] sm:$0xff] %v3325_v63  ;;  %v263_v4 = vand.u32 4294901760, %v218_v56  ;;  %v266_v5 = vand.u32 4294901760, %v219_v57  ;;  %v2734_v8 = vpack.c.bf16 %v705_v62, %v698_v58  ;;  %2715 = vmatprep.subr.bf16.mxu0 %v3325_v63  ;;  %v4341_v10 = vand.u32 4294901760, %v3281_v28  ;;  %v238_v58 = vld [vmem:[#allocation5 + $0xd0] sm:$0xff] }
  0x69   : > { %4513 = vst [vmem:[#allocation24_spill] sm:$0xff] %v3327_v0  ;;  %v712_v9 = vand.u32 4294901760, %v711_v1  ;;  %v4340_v11 = vand.u32 4294901760, %v3283_v29  ;;  %v719_v13 = vand.u32 4294901760, %v718_v3  ;;  %v317_v25 = vand.u32 4294901760, %v236_v6  ;;  %v222_v3 = vld [vmem:[#allocation5 + $0x50] sm:$0xff] }
  0x6a   : > { %v3339_v16 = vpack.c.bf16 %v266_v5, %v263_v4  ;;  %v3341_v17 = vsub.f32 %v218_v56, %v263_v4  ;;  %v3343_v18 = vsub.f32 %v219_v57, %v266_v5  ;;  %2735 = vmatprep.subr.bf16.mxu1 %v2734_v8  ;;  %v599_v19 = vsub.f32 %v3281_v28, %v4341_v10  ;;  %v243_v10 = vld [vmem:[#allocation5 + $0xf8] sm:$0xff] }
  0x6b   : > { %v606_v24 = vsub.f32 %v3283_v29, %v4340_v11  ;;  %v320_v30 = vand.u32 4294901760, %v237_v7  ;;  %2737 = vmatpush3.bf16.msra.mxu1 %v2736_v2  ;;  %v2738_v34 = vpack.c.bf16 %v719_v13, %v712_v9  ;;  %v4338_v35 = vand.u32 4294901760, %v3295_v40  ;;  %v242_v11 = vld [vmem:[#allocation5 + $0xf0] sm:$0xff] }
  0x6c   : > { %4514 = vst [vmem:[#allocation25_spill] sm:$0xff] %v3339_v16  ;;  %4515 = vst [vmem:[#allocation26_spill] sm:$0xff] %v3341_v17  ;;  %2717 = vmatpush3.bf16.msra.mxu0 %v3339_v16  ;;  %v4336_v38 = vand.u32 4294901760, %v3297_v41  ;;  %v269_v43 = vand.u32 4294901760, %v220_v12  ;;  %v600_v48 = vand.u32 4294901760, %v599_v19  ;;  %v3356_v51 = vsub.f32 %v236_v6, %v317_v25  ;;  %v223_v19 = vld [vmem:[#allocation5 + $0x58] sm:$0xff] }
  0x6d   : > { %4516 = vst [vmem:[#allocation27_spill] sm:$0xff] %v3343_v18  ;;  %v607_v49 = vand.u32 4294901760, %v606_v24  ;;  %v3354_v50 = vpack.c.bf16 %v320_v30, %v317_v25  ;;  %2739 = vmatprep.subr.bf16.mxu1 %v2738_v34  ;;  %v3358_v52 = vsub.f32 %v237_v7, %v320_v30  ;;  %v725_v53 = vsub.f32 %v3295_v40, %v4338_v35 }
  0x6e   : > { %v732_v56 = vsub.f32 %v3297_v41, %v4336_v38  ;;  %v272_v57 = vand.u32 4294901760, %v221_v31  ;;  %v3367_v62 = vsub.f32 %v220_v12, %v269_v43  ;;  %v4335_v1 = vand.u32 4294901760, %v3303_v46 }
  0x6f   : > { %4517 = vst [vmem:[#allocation28_spill] sm:$0xff] %v3354_v50  ;;  %v2740_v60 = vpack.c.bf16 %v607_v49, %v600_v48  ;;  %2719 = vmatprep.subr.bf16.mxu0 %v3354_v50  ;;  %v4333_v2 = vand.u32 4294901760, %v3305_v47  ;;  %v726_v4 = vand.u32 4294901760, %v725_v53  ;;  %v323_v12 = vand.u32 4294901760, %v238_v58 }
  0x70   : > { %v733_v5 = vand.u32 4294901760, %v732_v56  ;;  %v3371_v6 = vpack.c.bf16 %v272_v57, %v269_v43  ;;  %v3373_v7 = vsub.f32 %v221_v31, %v272_v57  ;;  %v613_v8 = vsub.f32 %v3303_v46, %v4335_v1  ;;  %v225_v1 = vld [vmem:[#allocation5 + $0x68] sm:$0xff] }
  0x71   : > { %2741 = vmatpush3.bf16.msra.mxu1 %v2740_v60  ;;  %v620_v9 = vsub.f32 %v3305_v47, %v4333_v2  ;;  %v326_v13 = vand.u32 4294901760, %v239_v59  ;;  %v4332_v25 = vand.u32 4294901760, %v3323_v61  ;;  %v4334_v30 = vand.u32 4294901760, %v3327_v0 }
  0x72   : > { %4518 = vst [vmem:[#allocation29_spill] sm:$0xff] %v3371_v6  ;;  %v2742_v24 = vpack.c.bf16 %v733_v5, %v726_v4  ;;  %2721 = vmatpush3.bf16.msra.mxu0 %v3371_v6  ;;  %v275_v31 = vand.u32 4294901760, %v222_v3  ;;  %v614_v34 = vand.u32 4294901760, %v613_v8  ;;  %v3386_v49 = vsub.f32 %v238_v58, %v323_v12  ;;  %v240_v4 = vld [vmem:[#allocation5 + $0xe0] sm:$0xff]  ;;  %v241_v5 = vld [vmem:[#allocation5 + $0xe8] sm:$0xff] }
  0x73   : > { %v621_v43 = vand.u32 4294901760, %v620_v9  ;;  %v3384_v48 = vpack.c.bf16 %v326_v13, %v323_v12  ;;  %v3388_v53 = vsub.f32 %v239_v59, %v326_v13  ;;  %v739_v56 = vsub.f32 %v3323_v61, %v4332_v25  ;;  %v224_v12 = vld [vmem:[#allocation5 + $0x60] sm:$0xff] }
  0x74   : > { %2743 = vmatprep.subr.bf16.mxu1 %v2742_v24  ;;  %v746_v57 = vsub.f32 %v3327_v0, %v4334_v30  ;;  %v278_v60 = vand.u32 4294901760, %v223_v19  ;;  %v3397_v9 = vsub.f32 %v222_v3, %v275_v31  ;;  %v4337_v58 = vand.u32 4294901760, %v3341_v17 }
  0x75   : > { %4519 = vst [vmem:[#allocation30_spill] sm:$0xff] %v3384_v48  ;;  %v2744_v8 = vpack.c.bf16 %v621_v43, %v614_v34  ;;  %2723 = vmatprep.subr.bf16.mxu0 %v3384_v48  ;;  %v4339_v59 = vand.u32 4294901760, %v3343_v18  ;;  %v740_v13 = vand.u32 4294901760, %v739_v56  ;;  %v329_v43 = vand.u32 4294901760, %v240_v4 }
  0x76   : > { %v747_v24 = vand.u32 4294901760, %v746_v57  ;;  %v3401_v25 = vpack.c.bf16 %v278_v60, %v275_v31  ;;  %v3403_v2 = vsub.f32 %v223_v19, %v278_v60  ;;  %v627_v34 = vsub.f32 %v3341_v17, %v4337_v58 }
  0x77   : > { %2745 = vmatpush3.bf16.msra.mxu1 %v2744_v8  ;;  %v634_v3 = vsub.f32 %v3343_v18, %v4339_v59  ;;  %v332_v30 = vand.u32 4294901760, %v241_v5  ;;  %v4349_v31 = vand.u32 4294901760, %v3356_v51  ;;  %v4347_v19 = vand.u32 4294901760, %v3358_v52 }
  0x78   : > { %4520 = vst [vmem:[#allocation31_spill] sm:$0xff] %v3401_v25  ;;  %v2746_v38 = vpack.c.bf16 %v747_v24, %v740_v13  ;;  %2725 = vmatpush3.bf16.msra.mxu0 %v3401_v25  ;;  %v281_v56 = vand.u32 4294901760, %v224_v12  ;;  %v628_v57 = vand.u32 4294901760, %v627_v34  ;;  %v3416_v58 = vsub.f32 %v240_v4, %v329_v43  ;;  %v226_v4 = vld [vmem:[#allocation5 + $0x70] sm:$0xff] }
  0x79   : > { %v635_v60 = vand.u32 4294901760, %v634_v3  ;;  %v3414_v8 = vpack.c.bf16 %v332_v30, %v329_v43  ;;  %v3418_v35 = vsub.f32 %v241_v5, %v332_v30  ;;  %v753_v13 = vsub.f32 %v3356_v51, %v4349_v31 }
  0x7a   : > { %2747 = vmatprep.subr.bf16.mxu1 %v2746_v38  ;;  %v760_v24 = vsub.f32 %v3358_v52, %v4347_v19  ;;  %v284_v59 = vand.u32 4294901760, %v225_v1  ;;  %v3427_v3 = vsub.f32 %v224_v12, %v281_v56  ;;  %v4346_v38 = vand.u32 4294901760, %v3367_v62 }
  0x7b   : > { %4521 = vst [vmem:[#allocation32_spill] sm:$0xff] %v3414_v8  ;;  %v2748_v34 = vpack.c.bf16 %v635_v60, %v628_v57  ;;  %2727 = vmatprep.subr.bf16.mxu0 %v3414_v8  ;;  %v4348_v30 = vand.u32 4294901760, %v3373_v7  ;;  %v754_v5 = vand.u32 4294901760, %v753_v13  ;;  %v335_v60 = vand.u32 4294901760, %v242_v11 }
  0x7c   : > { %4522 = vst [vmem:[#allocation33_spill] sm:$0xff] %v3427_v3  ;;  %v761_v43 = vand.u32 4294901760, %v760_v24  ;;  %v3431_v55 = vpack.c.bf16 %v284_v59, %v281_v56  ;;  %v3433_v54 = vsub.f32 %v225_v1, %v284_v59  ;;  %v641_v57 = vsub.f32 %v3367_v62, %v4346_v38 }
  0x7d   : > { %2749 = vmatpush3.bf16.msra.mxu1 %v2748_v34  ;;  %v648_v12 = vsub.f32 %v3373_v7, %v4348_v30  ;;  %v338_v37 = vand.u32 4294901760, %v243_v10  ;;  %v4352_v1 = vand.u32 4294901760, %v3386_v49  ;;  %v4353_v59 = vand.u32 4294901760, %v3388_v53 }
  0x7e   : > { %4523 = vst [vmem:[#allocation34_spill] sm:$0xff] %v3431_v55  ;;  %4524 = vst [vmem:[#allocation35_spill] sm:$0xff] %v3433_v54  ;;  %v2750_v13 = vpack.c.bf16 %v761_v43, %v754_v5  ;;  %2729 = vmatpush3.bf16.msra.mxu0 %v3431_v55  ;;  %v287_v56 = vand.u32 4294901760, %v226_v4  ;;  %v642_v24 = vand.u32 4294901760, %v641_v57  ;;  %v3446_v19 = vsub.f32 %v242_v11, %v335_v60 }
  0x7f   : > { %v649_v34 = vand.u32 4294901760, %v648_v12  ;;  %v3444_v38 = vpack.c.bf16 %v338_v37, %v335_v60  ;;  %v3448_v30 = vsub.f32 %v243_v10, %v338_v37  ;;  %v767_v5 = vsub.f32 %v3386_v49, %v4352_v1 }
  0x80   : > { %2751 = vmatprep.subr.bf16.mxu1 %v2750_v13  ;;  %v774_v43 = vsub.f32 %v3388_v53, %v4353_v59  ;;  %v290_v31 = vand.u32 4294901760, %v227_v36  ;;  %v3459_v12 = vsub.f32 %v226_v4, %v287_v56  ;;  %v4356_v11 = vand.u32 4294901760, %v3397_v9 }
  0x81   : > { %4525 = vst [vmem:[#allocation36_spill] sm:$0xff] %v3444_v38  ;;  %v2752_v57 = vpack.c.bf16 %v649_v34, %v642_v24  ;;  %2731 = vmatprep.subr.bf16.mxu0 %v3444_v38  ;;  %v4357_v37 = vand.u32 4294901760, %v3403_v2  ;;  %v768_v10 = vand.u32 4294901760, %v767_v5  ;;  %v3473_v34 = vand.u32 4294901760, %v181_v44  ;;  %v183_v5 = vld [vmem:[%s3254_s3 + $0x18] sm:$0xff] }
  0x82   : > { %4526 = vst [vmem:[#allocation37_spill] sm:$0xff] %v3459_v12  ;;  %v775_v60 = vand.u32 4294901760, %v774_v43  ;;  %v3463_v13 = vpack.c.bf16 %v290_v31, %v287_v56  ;;  %v3465_v1 = vsub.f32 %v227_v36, %v290_v31  ;;  %v655_v24 = vsub.f32 %v3397_v9, %v4356_v11 }
  0x83   : > { %2753 = vmatpush3.bf16.msra.mxu1 %v2752_v57  ;;  %v662_v4 = vsub.f32 %v3403_v2, %v4357_v37  ;;  %4528 = vst [vmem:[#allocation39_spill] sm:$0xff] %v3473_v34  ;;  %v3475_v59 = vand.u32 4294901760, %v180_v42  ;;  %v4364_v36 = vand.u32 4294901760, %v3416_v58  ;;  %v4367_v31 = vand.u32 4294901760, %v3418_v35  ;;  %806 = vmatprep.mubr.f32.mxu1 %v3473_v34 }
  0x84   : > { %4527 = vst [vmem:[#allocation38_spill] sm:$0xff] %v3463_v13  ;;  %v2754_v38 = vpack.c.bf16 %v775_v60, %v768_v10  ;;  %2733 = vmatpush3.bf16.msra.mxu0 %v3463_v13  ;;  %v4368_v56 = vand.u32 4294901760, %v3427_v3  ;;  %v656_v43 = vand.u32 4294901760, %v655_v24  ;;  %v3483_v11 = vsub.f32 %v181_v44, %v3473_v34 }
  0x85   : > { %4529 = vst [vmem:[#allocation40_spill] sm:$0xff] %v3475_v59  ;;  %v663_v57 = vand.u32 4294901760, %v662_v4  ;;  %v3486_v37 = vsub.f32 %v180_v42, %v3475_v59  ;;  %v781_v10 = vsub.f32 %v3416_v58, %v4364_v36  ;;  %v788_v60 = vsub.f32 %v3418_v35, %v4367_v31  ;;  %v182_v4 = vld [vmem:[%s3254_s3 + $0x10] sm:$0xff] }
  0x86   : > { %4530 = vst [vmem:[#allocation41_spill] sm:$0xff] %v3483_v11  ;;  %2755 = vmatprep.subr.bf16.mxu1 %v2754_v38  ;;  %v669_v24 = vsub.f32 %v3427_v3, %v4368_v56  ;;  %v4371_v44 = vand.u32 4294901760, %v3433_v54  ;;  %v4374_v13 = vand.u32 4294901760, %v3483_v11  ;;  %v3502_v34 = vand.u32 4294901760, %v183_v5 }
  0x87   : > { %4531 = vst [vmem:[#allocation42_spill] sm:$0xff] %v3486_v37  ;;  %v2756_v42 = vpack.c.bf16 %v663_v57, %v656_v43  ;;  %v4377_v38 = vand.u32 4294901760, %v3486_v37  ;;  %v782_v55 = vand.u32 4294901760, %v781_v10  ;;  %v789_v36 = vand.u32 4294901760, %v788_v60 }
  0x88   : > { %4532 = vst [vmem:[#allocation43_spill] sm:$0xff] %v3502_v34  ;;  %v670_v8 = vand.u32 4294901760, %v669_v24  ;;  %v676_v31 = vsub.f32 %v3433_v54, %v4371_v44  ;;  %v343_v56 = vsub.f32 %v3483_v11, %v4374_v13  ;;  %v3514_v57 = vsub.f32 %v183_v5, %v3502_v34 }
  0x89   : > { %2757 = vmatpush3.bf16.msra.mxu1 %v2756_v42  ;;  %v349_v43 = vsub.f32 %v3486_v37, %v4377_v38  ;;  %v3516_v10 = vand.u32 4294901760, %v182_v4  ;;  %v2758_v60 = vpack.c.bf16 %v789_v36, %v782_v55  ;;  %v4379_v3 = vand.u32 4294901760, %v3446_v19  ;;  %v185_v38 = vld [vmem:[%s3254_s3 + $0x28] sm:$0xff] }
  0x8a   : > { %4533 = vst [vmem:[#allocation44_spill] sm:$0xff] %v3514_v57  ;;  %v677_v24 = vand.u32 4294901760, %v676_v31  ;;  %v4378_v44 = vand.u32 4294901760, %v3448_v30  ;;  %v344_v42 = vand.u32 4294901760, %v343_v56  ;;  %v4380_v13 = vand.u32 4294901760, %v3514_v57 }
  0x8b   : > { %4534 = vst [vmem:[#allocation45_spill] sm:$0xff] %v3516_v10  ;;  %v350_v54 = vand.u32 4294901760, %v349_v43  ;;  %v3522_v11 = vsub.f32 %v182_v4, %v3516_v10  ;;  %2759 = vmatprep.subr.bf16.mxu1 %v2758_v60  ;;  %v795_v55 = vsub.f32 %v3446_v19, %v4379_v3  ;;  %v4386_v31 = vand.u32 4294901760, %v3459_v12  ;;  %v184_v60 = vld [vmem:[%s3254_s3 + $0x20] sm:$0xff] }
  0x8c   : > { %v2760_v5 = vpack.c.bf16 %v677_v24, %v670_v8  ;;  %v802_v36 = vsub.f32 %v3448_v30, %v4378_v44  ;;  %345 = vmatprep.mubr.f32.mxu0 %v344_v42  ;;  %v358_v56 = vsub.f32 %v3514_v57, %v4380_v13  ;;  %v2766_v43 = vpack.c.bf16 %v3288_v33, %v3286_v32  ;;  %v187_v13 = vld [vmem:[%s3254_s3 + $0x38] sm:$0xff]  ;;  %v186_v57 = vld [vmem:[%s3254_s3 + $0x30] sm:$0xff] }
  0x8d   : > { %4535 = vst [vmem:[#allocation46_spill] sm:$0xff] %v3522_v11  ;;  %351 = vmatmul.mubr.f32.vlgmr.msra.gmra.mrb[0].mxu0 %v350_v54  ;;  %v796_v24 = vand.u32 4294901760, %v795_v55  ;;  %v683_v42 = vsub.f32 %v3459_v12, %v4386_v31  ;;  %v3543_v3 = vand.u32 4294901760, %v185_v38  ;;  %v4537_v8 = vand.u32 4294901760, %v3522_v11  ;;  %v189_v55 = vld [vmem:[%s3254_s3 + $0x48] sm:$0xff] }
  0x8e   : > { %2761 = vmatpush3.bf16.msra.mxu1 %v2760_v5  ;;  %v803_v44 = vand.u32 4294901760, %v802_v36  ;;  %v359_v4 = vand.u32 4294901760, %v358_v56  ;;  %v4538_v33 = vand.u32 4294901760, %v3465_v1  ;;  %2767 = vmatprep.subr.bf16.mxu0 %v2766_v43  ;;  %v2768_v5 = vpack.c.bf16 %v3270_v21, %v3266_v15  ;;  %v188_v43 = vld [vmem:[%s3254_s3 + $0x40] sm:$0xff] }
  0x8f   : > { %4536 = vst [vmem:[#allocation47_spill] sm:$0xff] %v3543_v3  ;;  %v364_v37 = vsub.f32 %v3522_v11, %v4537_v8  ;;  %v684_v31 = vand.u32 4294901760, %v683_v42  ;;  %v3557_v56 = vsub.f32 %v185_v38, %v3543_v3  ;;  %v3559_v32 = vand.u32 4294901760, %v184_v60 }
  0x90   : > { %v690_v54 = vsub.f32 %v3465_v1, %v4538_v33  ;;  %v2762_v36 = vpack.c.bf16 %v803_v44, %v796_v24  ;;  %360 = vmatprep.mubr.f32.mxu0 %v359_v4  ;;  %2769 = vmatpush3.bf16.msra.mxu0 %v2768_v5  ;;  %v3561_v12 = vand.u32 4294901760, %v187_v13  ;;  %v3563_v33 = vand.u32 4294901760, %v186_v57  ;;  %v191_v4 = vld [vmem:[%s3254_s3 + $0x58] sm:$0xff] }
  0x91   : > { %4539 = vst [vmem:[#allocation48_spill] sm:$0xff] %v3557_v56  ;;  %4540 = vst [vmem:[#allocation49_spill] sm:$0xff] %v3559_v32  ;;  %v365_v8 = vand.u32 4294901760, %v364_v37  ;;  %v4395_v44 = vand.u32 4294901760, %v3557_v56  ;;  %v3568_v24 = vsub.f32 %v184_v60, %v3559_v32  ;;  %v2770_v38 = vpack.c.bf16 %v3277_v26, %v3274_v23  ;;  %v190_v37 = vld [vmem:[%s3254_s3 + $0x50] sm:$0xff] }
  0x92   : > { %v691_v11 = vand.u32 4294901760, %v690_v54  ;;  %4541 = vst [vmem:[#allocation50_spill] sm:$0xff] %v3561_v12  ;;  %4542 = vst [vmem:[#allocation51_spill] sm:$0xff] %v3563_v33  ;;  %2763 = vmatprep.subr.bf16.mxu1 %v2762_v36  ;;  %v3572_v42 = vand.u32 4294901760, %v189_v55  ;;  %v3577_v5 = vsub.f32 %v187_v13, %v3561_v12  ;;  %v3580_v21 = vsub.f32 %v186_v57, %v3563_v33 }
  0x93   : > { %4543 = vst [vmem:[#allocation52_spill] sm:$0xff] %v3568_v24  ;;  %366 = vmatmul.mubr.f32.gmra.mrb[2].mxu0 %v365_v8  ;;  %v2772_v36 = vpack.c.bf16 %v3283_v29, %v3281_v28  ;;  %v373_v60 = vsub.f32 %v3557_v56, %v4395_v44  ;;  %v4398_v26 = vand.u32 4294901760, %v3568_v24  ;;  %2771 = vmatprep.subr.bf16.mxu0 %v2770_v38  ;;  %v3597_v8 = vand.u32 4294901760, %v190_v37 }
  0x94   : > { %4544 = vst [vmem:[#allocation53_spill] sm:$0xff] %v3572_v42  ;;  %v2764_v54 = vpack.c.bf16 %v691_v11, %v684_v31  ;;  %4545 = vst [vmem:[#allocation54_spill] sm:$0xff] %v3577_v5  ;;  %v3589_v23 = vsub.f32 %v189_v55, %v3572_v42  ;;  %v3591_v11 = vand.u32 4294901760, %v188_v43  ;;  %v4401_v13 = vand.u32 4294901760, %v3577_v5 }
  0x95   : > { %4546 = vst [vmem:[#allocation55_spill] sm:$0xff] %v3580_v21  ;;  %v4404_v57 = vand.u32 4294901760, %v3580_v21  ;;  %2773 = vmatpush3.bf16.msra.mxu0 %v2772_v36  ;;  %v3595_v31 = vand.u32 4294901760, %v191_v4  ;;  %4550 = vst [vmem:[#allocation59_spill] sm:$0xff] %v3597_v8  ;;  %v374_v44 = vand.u32 4294901760, %v373_v60  ;;  %v379_v55 = vsub.f32 %v3568_v24, %v4398_v26  ;;  %v193_v24 = vld [vmem:[%s3254_s3 + $0x68] sm:$0xff] }
  0x96   : > { %4547 = vst [vmem:[#allocation56_spill] sm:$0xff] %v3589_v23  ;;  %4548 = vst [vmem:[#allocation57_spill] sm:$0xff] %v3591_v11  ;;  %2765 = vmatpush3.bf16.msra.mxu1 %v2764_v54  ;;  %v3605_v54 = vsub.f32 %v188_v43, %v3591_v11  ;;  %v388_v36 = vsub.f32 %v3577_v5, %v4401_v13  ;;  %v3617_v26 = vsub.f32 %v190_v37, %v3597_v8 }
  0x97   : > { %4549 = vst [vmem:[#allocation58_spill] sm:$0xff] %v3595_v31  ;;  %2799 = vmatprep.subr.bf16.mxu1 %v3264_v14  ;;  %v394_v60 = vsub.f32 %v3580_v21, %v4404_v57  ;;  %v3614_v56 = vsub.f32 %v191_v4, %v3595_v31  ;;  %375 = vmatprep.mubr.f32.mxu0 %v374_v44  ;;  %v380_v38 = vand.u32 4294901760, %v379_v55  ;;  %v4554_v43 = vand.u32 4294901760, %v3589_v23  ;;  %v192_v4 = vld [vmem:[%s3254_s3 + $0x60] sm:$0xff]  ;;  %v195_v21 = vld [vmem:[%s3254_s3 + $0x78] sm:$0xff] }
  0x98   : > { %4551 = vst [vmem:[#allocation60_spill] sm:$0xff] %v3605_v54  ;;  %4553 = vst [vmem:[#allocation62_spill] sm:$0xff] %v3617_v26  ;;  %v4414_v5 = vand.u32 4294901760, %v3605_v54  ;;  %v2774_v57 = vpack.c.bf16 %v3297_v41, %v3295_v40  ;;  %v389_v37 = vand.u32 4294901760, %v388_v36  ;;  %v3638_v41 = vand.u32 4294901760, %v193_v24 }
  0x99   : > { %4552 = vst [vmem:[#allocation61_spill] sm:$0xff] %v3614_v56  ;;  %808 = vmatmul.mubr.f32.vlgmr.msra.gmra.mrb[0].mxu1 %v3475_v59  ;;  %v403_v13 = vsub.f32 %v3589_v23, %v4554_v43  ;;  %v194_v59 = vld [vmem:[%s3254_s3 + $0x70] sm:$0xff]  ;;  %381 = vmatmul.mubr.f32.gmra.mrb[4].mxu0 %v380_v38  ;;  %v395_v43 = vand.u32 4294901760, %v394_v60  ;;  %v2776_v36 = vpack.c.bf16 %v3305_v47, %v3303_v46  ;;  %v4556_v55 = vand.u32 4294901760, %v3614_v56 }
  0x9a   : > { %2801 = vmatpush3.bf16.msra.mxu1 %v3268_v20  ;;  %813 = vmatprep.mubr.f32.mxu1 %v3502_v34  ;;  %v409_v23 = vsub.f32 %v3605_v54, %v4414_v5  ;;  %4555 = vst [vmem:[#allocation63_spill] sm:$0xff] %v3638_v41  ;;  %v3645_v60 = vand.u32 4294901760, %v192_v4  ;;  %v3647_v34 = vand.u32 4294901760, %v195_v21  ;;  %v197_v5 = vld [vmem:[%s3254_s3 + $0x88] sm:$0xff]  ;;  %v4559_v54 = vand.u32 4294901760, %v3617_v26 }
  0x9b   : > { %2803 = vmatprep.subr.bf16.mxu1 %v3272_v22  ;;  %390 = vmatprep.mubr.f32.mxu0 %v389_v37  ;;  %v404_v44 = vand.u32 4294901760, %v403_v13  ;;  %v418_v38 = vsub.f32 %v3614_v56, %v4556_v55  ;;  %v3655_v20 = vsub.f32 %v193_v24, %v3638_v41  ;;  %v3657_v13 = vand.u32 4294901760, %v194_v59  ;;  %v196_v37 = vld [vmem:[%s3254_s3 + $0x80] sm:$0xff]  ;;  %v199_v55 = vld [vmem:[%s3254_s3 + $0x98] sm:$0xff] }
  0x9c   : > { %2775 = vmatprep.subr.bf16.mxu0 %v2774_v57  ;;  %4557 = vst [vmem:[#allocation64_spill] sm:$0xff] %v3645_v60  ;;  %4558 = vst [vmem:[#allocation65_spill] sm:$0xff] %v3647_v34  ;;  %v424_v22 = vsub.f32 %v3617_v26, %v4559_v54  ;;  %v2778_v57 = vpack.c.bf16 %v3327_v0, %v3323_v61  ;;  %v410_v56 = vand.u32 4294901760, %v409_v23  ;;  %v210_v61 = vld [vmem:[%s3254_s3 + $0xf0] sm:$0xff] }
  0x9d   : > { %815 = vmatmul.mubr.f32.gmra.mrb[2].mxu1 %v3516_v10  ;;  %4560 = vst [vmem:[#allocation66_spill] sm:$0xff] %v3655_v20  ;;  %2777 = vmatpush3.bf16.msra.mxu0 %v2776_v36  ;;  %4561 = vst [vmem:[#allocation67_spill] sm:$0xff] %v3657_v13  ;;  %v419_v10 = vand.u32 4294901760, %v418_v38  ;;  %v3666_v54 = vsub.f32 %v192_v4, %v3645_v60  ;;  %v3669_v24 = vsub.f32 %v195_v21, %v3647_v34  ;;  %v198_v38 = vld [vmem:[%s3254_s3 + $0x90] sm:$0xff] }
  0x9e   : > { %820 = vmatprep.mubr.f32.mxu1 %v3543_v3  ;;  %2805 = vmatpush3.bf16.msra.mxu1 %v3279_v27  ;;  %v3674_v26 = vsub.f32 %v194_v59, %v3657_v13  ;;  %v3676_v3 = vand.u32 4294901760, %v197_v5  ;;  %v2780_v23 = vpack.c.bf16 %v3343_v18, %v3341_v17  ;;  %v3685_v36 = vand.u32 4294901760, %v199_v55 }
  0x9f   : > { %4562 = vst [vmem:[#allocation68_spill] sm:$0xff] %v3666_v54  ;;  %4563 = vst [vmem:[#allocation69_spill] sm:$0xff] %v3669_v24  ;;  %396 = vmatmul.mubr.f32.gmra.mrb[6].mxu0 %v395_v43  ;;  %2807 = vmatprep.subr.bf16.mxu1 %v3293_v39  ;;  %v4436_v4 = vand.u32 4294901760, %v3666_v54  ;;  %v3683_v43 = vand.u32 4294901760, %v196_v37  ;;  %v201_v39 = vld [vmem:[%s3254_s3 + $0xa8] sm:$0xff]  ;;  %v4566_v59 = vand.u32 4294901760, %v3655_v20 }
  0xa0   : > { %4564 = vst [vmem:[#allocation70_spill] sm:$0xff] %v3674_v26  ;;  %4565 = vst [vmem:[#allocation71_spill] sm:$0xff] %v3676_v3  ;;  %405 = vmatprep.mubr.f32.mxu0 %v404_v44  ;;  %2779 = vmatprep.subr.bf16.mxu0 %v2778_v57  ;;  %v3693_v18 = vsub.f32 %v197_v5, %v3676_v3  ;;  %v3701_v21 = vand.u32 4294901760, %v198_v38  ;;  %v4569_v44 = vand.u32 4294901760, %v3669_v24 }
  0xa1   : > { %822 = vmatmul.mubr.f32.gmra.mrb[4].mxu1 %v3559_v32  ;;  %v433_v27 = vsub.f32 %v3655_v20, %v4566_v59  ;;  %2781 = vmatpush3.bf16.msra.mxu0 %v2780_v23  ;;  %v3699_v57 = vsub.f32 %v196_v37, %v3683_v43  ;;  %v425_v59 = vand.u32 4294901760, %v424_v22  ;;  %v439_v5 = vsub.f32 %v3666_v54, %v4436_v4  ;;  %v200_v22 = vld [vmem:[%s3254_s3 + $0xa0] sm:$0xff]  ;;  %v202_v54 = vld [vmem:[%s3254_s3 + $0xb0] sm:$0xff] }
  0xa2   : > { %4567 = vst [vmem:[#allocation72_spill] sm:$0xff] %v3693_v18  ;;  %827 = vmatprep.mubr.f32.mxu1 %v3561_v12  ;;  %2809 = vmatpush3.bf16.msra.mxu1 %v3301_v45  ;;  %v3707_v23 = vand.u32 4294901760, %v201_v39  ;;  %v448_v37 = vsub.f32 %v3669_v24, %v4569_v44  ;;  %v3714_v20 = vsub.f32 %v199_v55, %v3685_v36  ;;  %v3736_v24 = vand.u32 4294901760, %v200_v22  ;;  %v205_v44 = vld [vmem:[%s3254_s3 + $0xc8] sm:$0xff] }
  0xa3   : > { %4568 = vst [vmem:[#allocation73_spill] sm:$0xff] %v3699_v57  ;;  %411 = vmatmul.mubr.f32.gmra.mrb[8].mxu0 %v410_v56  ;;  %2811 = vmatprep.subr.bf16.mxu1 %v3325_v63  ;;  %v434_v12 = vand.u32 4294901760, %v433_v27  ;;  %v203_v56 = vld [vmem:[%s3254_s3 + $0xb8] sm:$0xff]  ;;  %v2782_v4 = vpack.c.bf16 %v3358_v52, %v3356_v51  ;;  %v4571_v27 = vand.u32 4294901760, %v3674_v26  ;;  %v3729_v55 = vsub.f32 %v198_v38, %v3701_v21 }
  0xa4   : > { %420 = vmatprep.mubr.f32.mxu0 %v419_v10  ;;  %4570 = vst [vmem:[#allocation74_spill] sm:$0xff] %v3714_v20  ;;  %v2784_v32 = vpack.c.bf16 %v3373_v7, %v3367_v62  ;;  %v4574_v38 = vand.u32 4294901760, %v3693_v18  ;;  %v4596_v63 = vld [vmem:[#allocation38_spill] sm:$0xff] }
  0xa5   : > { %829 = vmatmul.mubr.f32.gmra.mrb[6].mxu1 %v3563_v33  ;;  %v454_v10 = vsub.f32 %v3674_v26, %v4571_v27  ;;  %4572 = vst [vmem:[#allocation75_spill] sm:$0xff] %v3729_v55  ;;  %v440_v33 = vand.u32 4294901760, %v439_v5  ;;  %2783 = vmatprep.subr.bf16.mxu0 %v2782_v4  ;;  %v3738_v27 = vand.u32 4294901760, %v203_v56  ;;  %v449_v26 = vand.u32 4294901760, %v448_v37  ;;  %v204_v4 = vld [vmem:[%s3254_s3 + $0xc0] sm:$0xff] }
  0xa6   : > { %834 = vmatprep.mubr.f32.mxu1 %v3572_v42  ;;  %2813 = vmatpush3.bf16.msra.mxu1 %v3339_v16  ;;  %v3734_v42 = vsub.f32 %v201_v39, %v3707_v23  ;;  %v463_v16 = vsub.f32 %v3693_v18, %v4574_v38  ;;  %v3745_v5 = vand.u32 4294901760, %v202_v54  ;;  %v2786_v39 = vpack.c.bf16 %v3388_v53, %v3386_v49 }
  0xa7   : > { %426 = vmatmul.mubr.f32.gmra.mrb[10].mxu0 %v425_v59  ;;  %2815 = vmatprep.subr.bf16.mxu1 %v3354_v50  ;;  %v4575_v37 = vand.u32 4294901760, %v3699_v57  ;;  %v3763_v50 = vsub.f32 %v200_v22, %v3736_v24  ;;  %v4578_v59 = vand.u32 4294901760, %v3714_v20  ;;  %v3776_v18 = vand.u32 4294901760, %v204_v4 }
  0xa8   : > { %4573 = vst [vmem:[#allocation76_spill] sm:$0xff] %v3734_v42  ;;  %435 = vmatprep.mubr.f32.mxu0 %v434_v12  ;;  %2785 = vmatpush3.bf16.msra.mxu0 %v2784_v32  ;;  %v455_v12 = vand.u32 4294901760, %v454_v10  ;;  %v3758_v32 = vand.u32 4294901760, %v205_v44  ;;  %v2788_v10 = vpack.c.bf16 %v3403_v2, %v3397_v9 }
  0xa9   : > { %836 = vmatmul.mubr.f32.gmra.mrb[8].mxu1 %v3591_v11  ;;  %v469_v38 = vsub.f32 %v3699_v57, %v4575_v37  ;;  %v207_v11 = vld [vmem:[%s3254_s3 + $0xd8] sm:$0xff]  ;;  %4576 = vst [vmem:[#allocation77_spill] sm:$0xff] %v3763_v50  ;;  %2787 = vmatprep.subr.bf16.mxu0 %v2786_v39  ;;  %v464_v37 = vand.u32 4294901760, %v463_v16  ;;  %v478_v57 = vsub.f32 %v3714_v20, %v4578_v59  ;;  %v4580_v59 = vand.u32 4294901760, %v3729_v55 }
  0xaa   : > { %841 = vmatprep.mubr.f32.mxu1 %v3595_v31  ;;  %2817 = vmatpush3.bf16.msra.mxu1 %v3371_v6  ;;  %v3766_v31 = vsub.f32 %v203_v56, %v3738_v27  ;;  %v3780_v22 = vand.u32 4294901760, %v207_v11  ;;  %v3784_v16 = vsub.f32 %v205_v44, %v3758_v32  ;;  %v206_v56 = vld [vmem:[%s3254_s3 + $0xd0] sm:$0xff]  ;;  %v209_v44 = vld [vmem:[%s3254_s3 + $0xe8] sm:$0xff] }
  0xab   : > { %441 = vmatmul.mubr.f32.gmra.mrb[12].mxu0 %v440_v33  ;;  %v3774_v33 = vsub.f32 %v202_v54, %v3745_v5  ;;  %2819 = vmatprep.subr.bf16.mxu1 %v3384_v48  ;;  %v2790_v54 = vpack.c.bf16 %v3418_v35, %v3416_v58  ;;  %v484_v39 = vsub.f32 %v3729_v55, %v4580_v59  ;;  %v479_v20 = vand.u32 4294901760, %v478_v57  ;;  %v4588_v6 = vld [vmem:[#allocation36_spill] sm:$0xff] }
  0xac   : > { %4577 = vst [vmem:[#allocation78_spill] sm:$0xff] %v3766_v31  ;;  %450 = vmatprep.mubr.f32.mxu0 %v449_v26  ;;  %2789 = vmatpush3.bf16.msra.mxu0 %v2788_v10  ;;  %v470_v26 = vand.u32 4294901760, %v469_v38  ;;  %v4581_v10 = vand.u32 4294901760, %v3734_v42  ;;  %v3805_v59 = vsub.f32 %v207_v11, %v3780_v22  ;;  %v4584_v38 = vld [vmem:[#allocation35_spill] sm:$0xff]  ;;  %v4586_v11 = vand.u32 4294901760, %v3763_v50 }
  0xad   : > { %4579 = vst [vmem:[#allocation79_spill] sm:$0xff] %v3774_v33  ;;  %843 = vmatmul.mubr.f32.gmra.mrb[10].mxu1 %v3597_v8  ;;  %v4582_v8 = vld [vmem:[#allocation32_spill] sm:$0xff]  ;;  %2791 = vmatprep.subr.bf16.mxu0 %v2790_v54  ;;  %v4589_v57 = vand.u32 4294901760, %v3774_v33 }
  0xae   : > { %848 = vmatprep.mubr.f32.mxu1 %v3638_v41  ;;  %2821 = vmatpush3.bf16.msra.mxu1 %v3401_v25  ;;  %v493_v41 = vsub.f32 %v3734_v42, %v4581_v10  ;;  %v3807_v10 = vand.u32 4294901760, %v206_v56  ;;  %v4583_v42 = vld [vmem:[#allocation33_spill] sm:$0xff]  ;;  %v4585_v25 = vld [vmem:[#allocation34_spill] sm:$0xff] }
  0xaf   : > { %456 = vmatmul.mubr.f32.gmra.mrb[14].mxu0 %v455_v12  ;;  %2823 = vmatprep.subr.bf16.mxu1 %v4582_v8  ;;  %v3801_v12 = vsub.f32 %v204_v4, %v3776_v18  ;;  %v2792_v55 = vpack.c.bf16 %v4584_v38, %v4583_v42  ;;  %v485_v4 = vand.u32 4294901760, %v484_v39  ;;  %v4587_v8 = vand.u32 4294901760, %v3766_v31  ;;  %v4594_v39 = vld [vmem:[#allocation18_spill] sm:$0xff] }
  0xb0   : > { %465 = vmatprep.mubr.f32.mxu0 %v464_v37  ;;  %v208_v37 = vld [vmem:[%s3254_s3 + $0xe0] sm:$0xff]  ;;  %v494_v54 = vand.u32 4294901760, %v493_v41  ;;  %v2794_v41 = vpack.c.bf16 %v3448_v30, %v3446_v19 }
  0xb1   : > { %850 = vmatmul.mubr.f32.gmra.mrb[12].mxu1 %v3645_v60  ;;  %v499_v60 = vsub.f32 %v3763_v50, %v4586_v11  ;;  %v508_v48 = vsub.f32 %v3766_v31, %v4587_v8  ;;  %2793 = vmatpush3.bf16.msra.mxu0 %v2792_v55  ;;  %v3834_v8 = vsub.f32 %v206_v56, %v3807_v10  ;;  %v211_v11 = vld [vmem:[%s3254_s3 + $0xf8] sm:$0xff]  ;;  %v4591_v55 = vand.u32 4294901760, %v3784_v16 }
  0xb2   : > { %855 = vmatprep.mubr.f32.mxu1 %v3647_v34  ;;  %2825 = vmatpush3.bf16.msra.mxu1 %v4585_v25  ;;  %v514_v34 = vsub.f32 %v3774_v33, %v4589_v57  ;;  %v3827_v25 = vand.u32 4294901760, %v209_v44  ;;  %v4590_v57 = vld [vmem:[#allocation37_spill] sm:$0xff]  ;;  %v4595_v50 = vand.u32 4294901760, %v4594_v39  ;;  %v4602_v39 = vand.u32 4294901760, %v3373_v7 }
  0xb3   : > { %471 = vmatmul.mubr.f32.gmra.mrb[16].mxu0 %v470_v26  ;;  %2827 = vmatprep.subr.bf16.mxu1 %v4588_v6  ;;  %v2796_v26 = vpack.c.bf16 %v3465_v1, %v4590_v57  ;;  %v523_v33 = vsub.f32 %v3784_v16, %v4591_v55  ;;  %v500_v6 = vand.u32 4294901760, %v499_v60  ;;  %v509_v45 = vand.u32 4294901760, %v508_v48 }
  0xb4   : > { %480 = vmatprep.mubr.f32.mxu0 %v479_v20  ;;  %v3836_v20 = vand.u32 4294901760, %v208_v37  ;;  %2795 = vmatprep.subr.bf16.mxu0 %v2794_v41  ;;  %v515_v17 = vand.u32 4294901760, %v514_v34  ;;  %v3851_v0 = vsub.f32 %v209_v44, %v3827_v25  ;;  %v543_v48 = vand.u32 4294901760, %v3834_v8 }
  0xb5   : > { %857 = vmatmul.mubr.f32.gmra.mrb[14].mxu1 %v3657_v13  ;;  %v4592_v13 = vld [vmem:[#allocation17_spill] sm:$0xff]  ;;  %2797 = vmatpush3.bf16.msra.mxu0 %v2796_v26  ;;  %v524_v44 = vand.u32 4294901760, %v523_v33  ;;  %v4601_v41 = vand.u32 4294901760, %v3367_v62  ;;  %v4607_v62 = vand.u32 4294901760, %v3416_v58  ;;  %v4608_v7 = vand.u32 4294901760, %v3418_v35 }
  0xb6   : > { %862 = vmatprep.mubr.f32.mxu1 %v3676_v3  ;;  %v4593_v31 = vand.u32 4294901760, %v4592_v13  ;;  %2829 = vmatpush3.bf16.msra.mxu1 %v4596_v63  ;;  %v3853_v3 = vand.u32 4294901760, %v211_v11  ;;  %v4597_v13 = vand.u32 4294901760, %v3801_v12  ;;  %v3865_v34 = vsub.f32 %v208_v37, %v3836_v20 }
  0xb7   : > { %486 = vmatmul.mubr.f32.gmra.mrb[18].mxu0 %v485_v4  ;;  %2863 = vmatprep.subr.bf16.mxu1 %v3264_v14  ;;  %v4599_v4 = vand.u32 4294901760, %v3356_v51  ;;  %v3879_v55 = vpack.c.bf16 %v4602_v39, %v4601_v41  ;;  %v4603_v37 = vand.u32 4294901760, %v3386_v49  ;;  %v3887_v14 = vand.u32 4294901760, %v210_v61 }
  0xb8   : > { %v2830_v56 = vpack.c.bf16 %v4595_v50, %v4593_v31  ;;  %495 = vmatprep.mubr.f32.mxu0 %v494_v54  ;;  %v529_v50 = vsub.f32 %v3801_v12, %v4597_v13  ;;  %v4598_v31 = vand.u32 4294901760, %v3805_v59  ;;  %v4600_v54 = vand.u32 4294901760, %v3358_v52 }
  0xb9   : > { %864 = vmatmul.mubr.f32.gmra.mrb[16].mxu1 %v3683_v43  ;;  %v4605_v51 = vand.u32 4294901760, %v3397_v9  ;;  %v4606_v52 = vand.u32 4294901760, %v3403_v2  ;;  %v4609_v49 = vand.u32 4294901760, %v4583_v42  ;;  %v3909_v9 = vsub.f32 %v211_v11, %v3853_v3 }
  0xba   : > { %v538_v60 = vsub.f32 %v3805_v59, %v4598_v31  ;;  %2831 = vmatprep.subr.bf16.mxu0 %v2830_v56  ;;  %869 = vmatprep.mubr.f32.mxu1 %v3685_v36  ;;  %v3873_v26 = vpack.c.bf16 %v4600_v54, %v4599_v4  ;;  %v4604_v56 = vand.u32 4294901760, %v3388_v53  ;;  %v3899_v31 = vpack.c.bf16 %v4608_v7, %v4607_v62  ;;  %v4617_v7 = vld [vmem:[#allocation12_spill] sm:$0xff] }
  0xbb   : > { %501 = vmatmul.mubr.f32.gmra.mrb[20].mxu0 %v500_v6  ;;  %v3893_v33 = vpack.c.bf16 %v4606_v52, %v4605_v51  ;;  %v4610_v53 = vand.u32 4294901760, %v4584_v38  ;;  %v552_v6 = vand.u32 4294901760, %v3851_v0  ;;  %v4611_v2 = vand.u32 4294901760, %v3446_v19  ;;  %v4615_v52 = vld [vmem:[#allocation41_spill] sm:$0xff] }
  0xbc   : > { %v3885_v13 = vpack.c.bf16 %v4604_v56, %v4603_v37  ;;  %510 = vmatprep.mubr.f32.mxu0 %v509_v45  ;;  %v4612_v58 = vand.u32 4294901760, %v3448_v30  ;;  %v4613_v35 = vand.u32 4294901760, %v4590_v57  ;;  %v4614_v42 = vand.u32 4294901760, %v3465_v1 }
  0xbd   : > { %v3905_v4 = vpack.c.bf16 %v4610_v53, %v4609_v49  ;;  %871 = vmatmul.mubr.f32.gmra.mrb[18].mxu1 %v3701_v21  ;;  %v530_v45 = vand.u32 4294901760, %v529_v50  ;;  %v544_v19 = vsub.f32 %v3834_v8, %v543_v48  ;;  %v558_v30 = vand.u32 4294901760, %v3865_v34 }
  0xbe   : > { %v3915_v54 = vpack.c.bf16 %v4612_v58, %v4611_v2  ;;  %v3921_v41 = vpack.c.bf16 %v4614_v42, %v4613_v35  ;;  %876 = vmatprep.mubr.f32.mxu1 %v3707_v23  ;;  %v3930_v38 = vsub.f32 %v210_v61, %v3887_v14  ;;  %v539_v11 = vand.u32 4294901760, %v538_v60  ;;  %v4619_v2 = vld [vmem:[#allocation14_spill] sm:$0xff]  ;;  %v4621_v35 = vld [vmem:[#allocation15_spill] sm:$0xff] }
  0xbf   : > { %516 = vmatmul.mubr.f32.gmra.mrb[22].mxu0 %v515_v17  ;;  %v553_v1 = vsub.f32 %v3851_v0, %v552_v6  ;;  %v567_v57 = vand.u32 4294901760, %v3909_v9  ;;  %v545_v17 = vand.u32 4294901760, %v544_v19  ;;  %v559_v50 = vsub.f32 %v3865_v34, %v558_v30  ;;  %v4623_v19 = vld [vmem:[#allocation42_spill] sm:$0xff] }
  0xc0   : > { %525 = vmatprep.mubr.f32.mxu0 %v524_v44  ;;  %v573_v61 = vand.u32 4294901760, %v3930_v38  ;;  %v4616_v62 = vand.u32 4294901760, %v3266_v15  ;;  %v4618_v49 = vand.u32 4294901760, %v4617_v7  ;;  %v4620_v58 = vand.u32 4294901760, %v4619_v2 }
  0xc1   : > { %878 = vmatmul.mubr.f32.gmra.mrb[20].mxu1 %v3736_v24  ;;  %v554_v60 = vand.u32 4294901760, %v553_v1  ;;  %v568_v44 = vsub.f32 %v3909_v9, %v567_v57  ;;  %v560_v39 = vand.u32 4294901760, %v559_v50  ;;  %v4622_v42 = vand.u32 4294901760, %v4621_v35 }
  0xc2   : > { %883 = vmatprep.mubr.f32.mxu1 %v3738_v27  ;;  %v574_v37 = vsub.f32 %v3930_v38, %v573_v61  ;;  %v2832_v53 = vpack.c.bf16 %v4618_v49, %v4616_v62  ;;  %v4625_v1 = vand.u32 4294901760, %v3281_v28  ;;  %v4626_v15 = vand.u32 4294901760, %v3283_v29 }
  0xc3   : > { %531 = vmatmul.mubr.f32.gmra.mrb[24].mxu0 %v530_v45  ;;  %v569_v56 = vand.u32 4294901760, %v568_v44  ;;  %v2834_v45 = vpack.c.bf16 %v4622_v42, %v4620_v58  ;;  %v4627_v50 = vand.u32 4294901760, %v3295_v40  ;;  %v4633_v28 = vand.u32 4294901760, %v3303_v46  ;;  %v4636_v40 = vld [vmem:[#allocation22_spill] sm:$0xff]  ;;  %v4640_v58 = vld [vmem:[#allocation11_spill] sm:$0xff]  ;;  %v4642_v42 = vld [vmem:[#allocation52_spill] sm:$0xff] }
  0xc4   : > { %540 = vmatprep.mubr.f32.mxu0 %v539_v11  ;;  %v575_v51 = vand.u32 4294901760, %v574_v37  ;;  %v4624_v11 = vld [vmem:[#allocation44_spill] sm:$0xff]  ;;  %v4630_v37 = vand.u32 4294901760, %v4615_v52  ;;  %v4634_v29 = vand.u32 4294901760, %v3305_v47  ;;  %v4635_v7 = vand.u32 4294901760, %v4623_v19  ;;  %v4643_v46 = vld [vmem:[#allocation13_spill] sm:$0xff] }
  0xc5   : > { %885 = vmatmul.mubr.f32.gmra.mrb[22].mxu1 %v3745_v5  ;;  %v4637_v49 = vand.u32 4294901760, %v4636_v40  ;;  %v4641_v35 = vand.u32 4294901760, %v4624_v11  ;;  %v4644_v47 = vld [vmem:[#allocation54_spill] sm:$0xff] }
  0xc6   : > { %890 = vmatprep.mubr.f32.mxu1 %v3758_v32  ;;  %v2840_v62 = vpack.c.bf16 %v4634_v29, %v4633_v28  ;;  %v4655_v28 = vand.u32 4294901760, %v4642_v42  ;;  %v4657_v29 = vld [vmem:[#allocation21_spill] sm:$0xff] }
  0xc7   : > { %546 = vmatmul.mubr.f32.gmra.mrb[26].mxu0 %v545_v17  ;;  %v2836_v17 = vpack.c.bf16 %v4626_v15, %v4625_v1  ;;  %v4647_v1 = vld [vmem:[#allocation27_spill] sm:$0xff] }
  0xc8   : > { %555 = vmatprep.mubr.f32.mxu0 %v554_v60  ;;  %v4628_v60 = vld [vmem:[#allocation20_spill] sm:$0xff]  ;;  %v4648_v15 = vand.u32 4294901760, %v4647_v1 }
  0xc9   : > { %892 = vmatmul.mubr.f32.gmra.mrb[24].mxu1 %v3776_v18  ;;  %v4629_v44 = vand.u32 4294901760, %v4628_v60  ;;  %v4678_v1 = vld [vmem:[#allocation72_spill] sm:$0xff] }
  0xca   : > { %897 = vmatprep.mubr.f32.mxu1 %v3780_v22 }
  0xcb   : > { %561 = vmatmul.mubr.f32.gmra.mrb[28].mxu0 %v560_v39  ;;  %v2838_v39 = vpack.c.bf16 %v4629_v44, %v4627_v50  ;;  %v4652_v44 = vld [vmem:[#allocation55_spill] sm:$0xff] }
  0xcc   : > { %570 = vmatprep.mubr.f32.mxu0 %v569_v56  ;;  %v4631_v56 = vld [vmem:[#allocation46_spill] sm:$0xff]  ;;  %v4661_v40 = vand.u32 4294901760, %v4652_v44 }
  0xcd   : > { %899 = vmatmul.mubr.f32.gmra.mrb[26].mxu1 %v3807_v10  ;;  %v4649_v50 = vand.u32 4294901760, %v4631_v56 }
  0xce   : > { %904 = vmatprep.mubr.f32.mxu1 %v3827_v25 }
  0xcf   : > { %576 = vmatmul.mubr.f32.gmra.mrb[30].mxu0 %v575_v51  ;;  %v4632_v51 = vld [vmem:[#allocation48_spill] sm:$0xff] }
  0xd0   : > { %1048 = vmatprep.mubr.f32.mxu0 %v4615_v52  ;;  %v4650_v60 = vand.u32 4294901760, %v4632_v51 }
  0xd1   : > { %906 = vmatmul.mubr.f32.gmra.mrb[28].mxu1 %v3836_v20 }
  0xd2   : > { %911 = vmatprep.mubr.f32.mxu1 %v3853_v3 }
  0xd3   : > { %1051 = vmatmul.mubr.f32.vlgmr.msra.gmra.mrb[32].mxu0 %v4623_v19 }
  0xd4   : > { %1057 = vmatprep.mubr.f32.mxu0 %v4624_v11  ;;  %2833 = vmatpush3.bf16.msra.mxu0 %v2832_v53  ;;  %v4638_v53 = vld [vmem:[#allocation24_spill] sm:$0xff] }
  0xd5   : > { %913 = vmatmul.mubr.f32.gmra.mrb[30].mxu1 %v3887_v14  ;;  %2835 = vmatprep.subr.bf16.mxu0 %v2834_v45  ;;  %v4639_v2 = vand.u32 4294901760, %v4638_v53  ;;  %v4645_v45 = vld [vmem:[#allocation26_spill] sm:$0xff]  ;;  %v4651_v11 = vld [vmem:[#allocation16_spill] sm:$0xff] }
  0xd6   : > { %1290 = vmatprep.mubr.f32.mxu1 %v4630_v37  ;;  %v4646_v19 = vand.u32 4294901760, %v4645_v45  ;;  %v4654_v37 = vld [vmem:[#allocation56_spill] sm:$0xff]  ;;  %v4664_v53 = vld [vmem:[#allocation62_spill] sm:$0xff] }
  0xd7   : > { %1060 = vmatmul.mubr.f32.gmra.mrb[34].mxu0 %v4631_v56  ;;  %v2842_v52 = vpack.c.bf16 %v4639_v2, %v4637_v49  ;;  %v4656_v56 = vand.u32 4294901760, %v4644_v47  ;;  %v4663_v49 = vld [vmem:[#allocation25_spill] sm:$0xff]  ;;  %v4665_v2 = vld [vmem:[#allocation28_spill] sm:$0xff]  ;;  %v4676_v45 = vld [vmem:[#allocation70_spill] sm:$0xff] }
  0xd8   : > { %1066 = vmatprep.mubr.f32.mxu0 %v4632_v51  ;;  %2837 = vmatpush3.bf16.msra.mxu0 %v2836_v17  ;;  %v2844_v17 = vpack.c.bf16 %v4648_v15, %v4646_v19  ;;  %v4658_v51 = vld [vmem:[#allocation60_spill] sm:$0xff] }
  0xd9   : > { %1294 = vmatmul.mubr.f32.vlgmr.msra.gmra.mrb[32].mxu1 %v4635_v7  ;;  %2839 = vmatprep.subr.bf16.mxu0 %v2838_v39  ;;  %v4653_v39 = vld [vmem:[#allocation19_spill] sm:$0xff]  ;;  %v4660_v7 = vld [vmem:[#allocation61_spill] sm:$0xff]  ;;  %v4677_v19 = vld [vmem:[#allocation32_spill] sm:$0xff] }
  0xda   : > { %2865 = vmatpush3.bf16.msra.mxu1 %v4640_v58  ;;  %1301 = vmatprep.mubr.f32.mxu1 %v4641_v35  ;;  %v4669_v58 = vld [vmem:[#allocation29_spill] sm:$0xff]  ;;  %v4670_v35 = vld [vmem:[#allocation68_spill] sm:$0xff] }
  0xdb   : > { %1069 = vmatmul.mubr.f32.gmra.mrb[36].mxu0 %v4642_v42  ;;  %2867 = vmatprep.subr.bf16.mxu1 %v4643_v46  ;;  %v4671_v42 = vld [vmem:[#allocation30_spill] sm:$0xff]  ;;  %v4672_v46 = vld [vmem:[#allocation69_spill] sm:$0xff] }
  0xdc   : > { %1075 = vmatprep.mubr.f32.mxu0 %v4644_v47  ;;  %2841 = vmatpush3.bf16.msra.mxu0 %v2840_v62  ;;  %v4659_v62 = vld [vmem:[#allocation23_spill] sm:$0xff]  ;;  %v4680_v15 = vand.u32 4294901760, %v4672_v46 }
  0xdd   : > { %1305 = vmatmul.mubr.f32.gmra.mrb[34].mxu1 %v4649_v50  ;;  %2843 = vmatprep.subr.bf16.mxu0 %v2842_v52  ;;  %v4666_v52 = vld [vmem:[#allocation66_spill] sm:$0xff]  ;;  %v4675_v47 = vld [vmem:[#allocation31_spill] sm:$0xff]  ;;  %v4683_v50 = vld [vmem:[#allocation36_spill] sm:$0xff] }
  0xde   : > { %1312 = vmatprep.mubr.f32.mxu1 %v4650_v60  ;;  %2869 = vmatpush3.bf16.msra.mxu1 %v4651_v11  ;;  %v4684_v60 = vld [vmem:[#allocation74_spill] sm:$0xff]  ;;  %v4685_v11 = vand.u32 4294901760, %v4676_v45 }
  0xdf   : > { %1078 = vmatmul.mubr.f32.gmra.mrb[38].mxu0 %v4652_v44  ;;  %2871 = vmatprep.subr.bf16.mxu1 %v4653_v39  ;;  %v4686_v44 = vand.u32 4294901760, %v4678_v1  ;;  %v4688_v39 = vld [vmem:[#allocation76_spill] sm:$0xff] }
  0xe0   : > { %1084 = vmatprep.mubr.f32.mxu0 %v4654_v37  ;;  %2845 = vmatpush3.bf16.msra.mxu0 %v2844_v17  ;;  %v4682_v17 = vld [vmem:[#allocation73_spill] sm:$0xff] }
  0xe1   : > { %1316 = vmatmul.mubr.f32.gmra.mrb[36].mxu1 %v4655_v28  ;;  %2847 = vmatprep.subr.bf16.mxu0 %v3873_v26  ;;  %v4662_v26 = vand.u32 4294901760, %v4654_v37  ;;  %v4689_v37 = vand.u32 4294901760, %v4682_v17  ;;  %v4690_v28 = vand.u32 4294901760, %v4684_v60 }
  0xe2   : > { %1323 = vmatprep.mubr.f32.mxu1 %v4656_v56  ;;  %2873 = vmatpush3.bf16.msra.mxu1 %v4657_v29  ;;  %v4691_v56 = vld [vmem:[#allocation77_spill] sm:$0xff]  ;;  %v4692_v29 = vld [vmem:[#allocation78_spill] sm:$0xff] }
  0xe3   : > { %1087 = vmatmul.mubr.f32.gmra.mrb[40].mxu0 %v4658_v51  ;;  %2875 = vmatprep.subr.bf16.mxu1 %v4659_v62  ;;  %v4694_v62 = vand.u32 4294901760, %v4688_v39 }
  0xe4   : > { %1093 = vmatprep.mubr.f32.mxu0 %v4660_v7  ;;  %2849 = vmatpush3.bf16.msra.mxu0 %v3879_v55  ;;  %v4667_v55 = vand.u32 4294901760, %v4658_v51 }
  0xe5   : > { %1327 = vmatmul.mubr.f32.gmra.mrb[38].mxu1 %v4661_v40  ;;  %2851 = vmatprep.subr.bf16.mxu0 %v3885_v13  ;;  %v4668_v13 = vand.u32 4294901760, %v4660_v7  ;;  %v4696_v7 = vand.u32 4294901760, %v4691_v56  ;;  %v4697_v40 = vand.u32 4294901760, %v4692_v29 }
  0xe6   : > { %1334 = vmatprep.mubr.f32.mxu1 %v4662_v26  ;;  %2877 = vmatpush3.bf16.msra.mxu1 %v4663_v49  ;;  %v4699_v49 = vand.u32 4294901760, %v3784_v16 }
  0xe7   : > { %1096 = vmatmul.mubr.f32.gmra.mrb[42].mxu0 %v4664_v53  ;;  %2879 = vmatprep.subr.bf16.mxu1 %v4665_v2  ;;  %v4701_v2 = vand.u32 4294901760, %v3805_v59 }
  0xe8   : > { %1102 = vmatprep.mubr.f32.mxu0 %v4666_v52  ;;  %2853 = vmatpush3.bf16.msra.mxu0 %v3893_v33  ;;  %v4673_v33 = vand.u32 4294901760, %v4664_v53  ;;  %v4700_v53 = vand.u32 4294901760, %v3801_v12 }
  0xe9   : > { %1338 = vmatmul.mubr.f32.gmra.mrb[40].mxu1 %v4667_v55  ;;  %2855 = vmatprep.subr.bf16.mxu0 %v3899_v31  ;;  %v4674_v31 = vand.u32 4294901760, %v4666_v52  ;;  %v4715_v52 = vld [vmem:[#allocation64_spill] sm:$0xff]  ;;  %v4716_v55 = vld [vmem:[#allocation65_spill] sm:$0xff] }
  0xea   : > { %1345 = vmatprep.mubr.f32.mxu1 %v4668_v13  ;;  %2881 = vmatpush3.bf16.msra.mxu1 %v4669_v58  ;;  %v4717_v13 = vld [vmem:[#allocation67_spill] sm:$0xff] }
  0xeb   : > { %1105 = vmatmul.mubr.f32.gmra.mrb[44].mxu0 %v4670_v35  ;;  %2883 = vmatprep.subr.bf16.mxu1 %v4671_v42  ;;  %v4718_v58 = vld [vmem:[#allocation71_spill] sm:$0xff] }
  0xec   : > { %1111 = vmatprep.mubr.f32.mxu0 %v4672_v46  ;;  %2857 = vmatpush3.bf16.msra.mxu0 %v3905_v4  ;;  %v4679_v4 = vand.u32 4294901760, %v4670_v35 }
  0xed   : > { %1349 = vmatmul.mubr.f32.gmra.mrb[42].mxu1 %v4673_v33  ;;  %2859 = vmatprep.subr.bf16.mxu0 %v3915_v54  ;;  %v4681_v54 = vld [vmem:[#allocation34_spill] sm:$0xff] }
  0xee   : > { %1356 = vmatprep.mubr.f32.mxu1 %v4674_v31  ;;  %2885 = vmatpush3.bf16.msra.mxu1 %v4675_v47 }
  0xef   : > { %1114 = vmatmul.mubr.f32.gmra.mrb[46].mxu0 %v4676_v45  ;;  %2887 = vmatprep.subr.bf16.mxu1 %v4677_v19 }
  0xf0   : > { %1120 = vmatprep.mubr.f32.mxu0 %v4678_v1  ;;  %2861 = vmatpush3.bf16.msra.mxu0 %v3921_v41  ;;  %v4687_v41 = vld [vmem:[#allocation75_spill] sm:$0xff] }
  0xf1   : > { %1360 = vmatmul.mubr.f32.gmra.mrb[44].mxu1 %v4679_v4  ;;  %v4693_v51 = vand.u32 4294901760, %v4687_v41 }
  0xf2   : > { %1367 = vmatprep.mubr.f32.mxu1 %v4680_v15  ;;  %2889 = vmatpush3.bf16.msra.mxu1 %v4681_v54 }
  0xf3   : > { %1123 = vmatmul.mubr.f32.gmra.mrb[48].mxu0 %v4682_v17  ;;  %2891 = vmatprep.subr.bf16.mxu1 %v4683_v50 }
  0xf4   : > { %1129 = vmatprep.mubr.f32.mxu0 %v4684_v60 }
  0xf5   : > { %1371 = vmatmul.mubr.f32.gmra.mrb[46].mxu1 %v4685_v11 }
  0xf6   : > { %1378 = vmatprep.mubr.f32.mxu1 %v4686_v44  ;;  %2893 = vmatpush3.bf16.msra.mxu1 %v4596_v63  ;;  %v4695_v63 = vld [vmem:[#allocation79_spill] sm:$0xff] }
  0xf7   : > { %1132 = vmatmul.mubr.f32.gmra.mrb[50].mxu0 %v4687_v41  ;;  %v4698_v26 = vand.u32 4294901760, %v4695_v63 }
  0xf8   : > { %1138 = vmatprep.mubr.f32.mxu0 %v4688_v39 }
  0xf9   : > { %1382 = vmatmul.mubr.f32.gmra.mrb[48].mxu1 %v4689_v37 }
  0xfa   : > { %1389 = vmatprep.mubr.f32.mxu1 %v4690_v28 }
  0xfb   : > { %1141 = vmatmul.mubr.f32.gmra.mrb[52].mxu0 %v4691_v56 }
  0xfc   : > { %1147 = vmatprep.mubr.f32.mxu0 %v4692_v29 }
  0xfd   : > { %1393 = vmatmul.mubr.f32.gmra.mrb[50].mxu1 %v4693_v51 }
  0xfe   : > { %1400 = vmatprep.mubr.f32.mxu1 %v4694_v62 }
  0xff   : > { %1150 = vmatmul.mubr.f32.gmra.mrb[54].mxu0 %v4695_v63 }
 0x100   : > { %1156 = vmatprep.mubr.f32.mxu0 %v3784_v16  ;;  %v4702_v16 = vld [vmem:[#allocation39_spill] sm:$0xff] }
 0x101   : > { %1404 = vmatmul.mubr.f32.gmra.mrb[52].mxu1 %v4696_v7 }
 0x102   : > { %1411 = vmatprep.mubr.f32.mxu1 %v4697_v40 }
 0x103   : > { %1159 = vmatmul.mubr.f32.gmra.mrb[56].mxu0 %v3801_v12  ;;  %v4703_v12 = vld [vmem:[#allocation40_spill] sm:$0xff] }
 0x104   : > { %1165 = vmatprep.mubr.f32.mxu0 %v3805_v59  ;;  %v4704_v59 = vld [vmem:[#allocation43_spill] sm:$0xff] }
 0x105   : > { %1415 = vmatmul.mubr.f32.gmra.mrb[54].mxu1 %v4698_v26 }
 0x106   : > { %1422 = vmatprep.mubr.f32.mxu1 %v4699_v49 }
 0x107   : > { %1168 = vmatmul.mubr.f32.gmra.mrb[58].mxu0 %v3834_v8  ;;  %v4706_v8 = vld [vmem:[#allocation47_spill] sm:$0xff] }
 0x108   : > { %1174 = vmatprep.mubr.f32.mxu0 %v3851_v0  ;;  %v4705_v0 = vld [vmem:[#allocation45_spill] sm:$0xff] }
 0x109   : > { %1426 = vmatmul.mubr.f32.gmra.mrb[56].mxu1 %v4700_v53 }
 0x10a   : > { %1433 = vmatprep.mubr.f32.mxu1 %v4701_v2 }
 0x10b   : > { %1177 = vmatmul.mubr.f32.gmra.mrb[60].mxu0 %v3865_v34  ;;  %v4708_v34 = vld [vmem:[#allocation50_spill] sm:$0xff] }
 0x10c   : > { %1183 = vmatprep.mubr.f32.mxu0 %v3909_v9  ;;  %v4710_v9 = vld [vmem:[#allocation53_spill] sm:$0xff] }
 0x10d   : > { %1437 = vmatmul.mubr.f32.gmra.mrb[58].mxu1 %v543_v48  ;;  %v4707_v48 = vld [vmem:[#allocation49_spill] sm:$0xff] }
 0x10e   : > { %1444 = vmatprep.mubr.f32.mxu1 %v552_v6  ;;  %v4709_v6 = vld [vmem:[#allocation51_spill] sm:$0xff] }
 0x10f   : > { %1186 = vmatmul.mubr.f32.gmra.mrb[62].mxu0 %v3930_v38  ;;  %v4712_v38 = vld [vmem:[#allocation58_spill] sm:$0xff] }
 0x110   : > { %1625 = vmatprep.mubr.f32.mxu0 %v4702_v16 }
 0x111   : > { %1448 = vmatmul.mubr.f32.gmra.mrb[60].mxu1 %v558_v30  ;;  %v4711_v30 = vld [vmem:[#allocation57_spill] sm:$0xff] }
 0x112   : > { %1455 = vmatprep.mubr.f32.mxu1 %v567_v57  ;;  %v4713_v57 = vld [vmem:[#allocation59_spill] sm:$0xff] }
 0x113   : > { %1627 = vmatmul.mubr.f32.vlgmr.msra.gmra.mrb[64].mxu0 %v4703_v12 }
 0x114   : > { %1632 = vmatprep.mubr.f32.mxu0 %v4704_v59 }
 0x115   : > { %1459 = vmatmul.mubr.f32.gmra.mrb[62].mxu1 %v573_v61  ;;  %v4714_v61 = vld [vmem:[#allocation63_spill] sm:$0xff] }
 0x116   : > { %1834 = vmatprep.mubr.f32.mxu1 %v4702_v16 }
 0x117   : > { %1634 = vmatmul.mubr.f32.gmra.mrb[66].mxu0 %v4705_v0 }
 0x118   : > { %1639 = vmatprep.mubr.f32.mxu0 %v4706_v8 }
 0x119   : > { %1836 = vmatmul.mubr.f32.vlgmr.msra.gmra.mrb[64].mxu1 %v4703_v12 }
 0x11a   : > { %1841 = vmatprep.mubr.f32.mxu1 %v4704_v59 }
 0x11b   : > { %1641 = vmatmul.mubr.f32.gmra.mrb[68].mxu0 %v4707_v48 }
 0x11c   : > { %1646 = vmatprep.mubr.f32.mxu0 %v4708_v34 }
 0x11d   : > { %1843 = vmatmul.mubr.f32.gmra.mrb[66].mxu1 %v4705_v0 }
 0x11e   : > { %1848 = vmatprep.mubr.f32.mxu1 %v4706_v8 }
 0x11f   : > { %1648 = vmatmul.mubr.f32.gmra.mrb[70].mxu0 %v4709_v6 }
 0x120   : > { %1653 = vmatprep.mubr.f32.mxu0 %v4710_v9 }
 0x121   : > { %1850 = vmatmul.mubr.f32.gmra.mrb[68].mxu1 %v4707_v48 }
 0x122   : > { %1855 = vmatprep.mubr.f32.mxu1 %v4708_v34 }
 0x123   : > { %1655 = vmatmul.mubr.f32.gmra.mrb[72].mxu0 %v4711_v30 }
 0x124   : > { %1660 = vmatprep.mubr.f32.mxu0 %v4712_v38 }
 0x125   : > { %1857 = vmatmul.mubr.f32.gmra.mrb[70].mxu1 %v4709_v6 }
 0x126   : > { %1862 = vmatprep.mubr.f32.mxu1 %v4710_v9 }
 0x127   : > { %1662 = vmatmul.mubr.f32.gmra.mrb[74].mxu0 %v4713_v57 }
 0x128   : > { %1667 = vmatprep.mubr.f32.mxu0 %v4714_v61 }
 0x129   : > { %1864 = vmatmul.mubr.f32.gmra.mrb[72].mxu1 %v4711_v30 }
 0x12a   : > { %1869 = vmatprep.mubr.f32.mxu1 %v4712_v38 }
 0x12b   : > { %1669 = vmatmul.mubr.f32.gmra.mrb[76].mxu0 %v4715_v52 }
 0x12c   : > { %1674 = vmatprep.mubr.f32.mxu0 %v4716_v55 }
 0x12d   : > { %1871 = vmatmul.mubr.f32.gmra.mrb[74].mxu1 %v4713_v57 }
 0x12e   : > { %1876 = vmatprep.mubr.f32.mxu1 %v4714_v61 }
 0x12f   : > { %1676 = vmatmul.mubr.f32.gmra.mrb[78].mxu0 %v4717_v13 }
 0x130   : > { %1681 = vmatprep.mubr.f32.mxu0 %v4718_v58 }
 0x131   : > { %1878 = vmatmul.mubr.f32.gmra.mrb[76].mxu1 %v4715_v52 }
 0x132   : > { %1883 = vmatprep.mubr.f32.mxu1 %v4716_v55 }
 0x133   : > { %1683 = vmatmul.mubr.f32.gmra.mrb[80].mxu0 %v3683_v43 }
 0x134   : > { %1688 = vmatprep.mubr.f32.mxu0 %v3685_v36 }
 0x135   : > { %1885 = vmatmul.mubr.f32.gmra.mrb[78].mxu1 %v4717_v13 }
 0x136   : > { %1890 = vmatprep.mubr.f32.mxu1 %v4718_v58 }
 0x137   : > { %1690 = vmatmul.mubr.f32.gmra.mrb[82].mxu0 %v3701_v21 }
 0x138   : > { %1695 = vmatprep.mubr.f32.mxu0 %v3707_v23 }
 0x139   : > { %1892 = vmatmul.mubr.f32.gmra.mrb[80].mxu1 %v3683_v43 }
 0x13a   : > { %1897 = vmatprep.mubr.f32.mxu1 %v3685_v36 }
 0x13b   : > { %1697 = vmatmul.mubr.f32.gmra.mrb[84].mxu0 %v3736_v24 }
 0x13c   : > { %1702 = vmatprep.mubr.f32.mxu0 %v3738_v27 }
 0x13d   : > { %1899 = vmatmul.mubr.f32.gmra.mrb[82].mxu1 %v3701_v21 }
 0x13e   : > { %1904 = vmatprep.mubr.f32.mxu1 %v3707_v23 }
 0x13f   : > { %1704 = vmatmul.mubr.f32.gmra.mrb[86].mxu0 %v3745_v5 }
 0x140   : > { %1709 = vmatprep.mubr.f32.mxu0 %v3758_v32 }
 0x141   : > { %1906 = vmatmul.mubr.f32.gmra.mrb[84].mxu1 %v3736_v24 }
 0x142   : > { %1911 = vmatprep.mubr.f32.mxu1 %v3738_v27 }
 0x143   : > { %1711 = vmatmul.mubr.f32.gmra.mrb[88].mxu0 %v3776_v18 }
 0x144   : > { %1716 = vmatprep.mubr.f32.mxu0 %v3780_v22 }
 0x145   : > { %1913 = vmatmul.mubr.f32.gmra.mrb[86].mxu1 %v3745_v5 }
 0x146   : > { %1918 = vmatprep.mubr.f32.mxu1 %v3758_v32 }
 0x147   : > { %1718 = vmatmul.mubr.f32.gmra.mrb[90].mxu0 %v3807_v10 }
 0x148   : > { %1723 = vmatprep.mubr.f32.mxu0 %v3827_v25 }
 0x149   : > { %1920 = vmatmul.mubr.f32.gmra.mrb[88].mxu1 %v3776_v18 }
 0x14a   : > { %1925 = vmatprep.mubr.f32.mxu1 %v3780_v22 }
 0x14b   : > { %1725 = vmatmul.mubr.f32.gmra.mrb[92].mxu0 %v3836_v20 }
 0x14c   : > { %1730 = vmatprep.mubr.f32.mxu0 %v3853_v3 }
 0x14d   : > { %1927 = vmatmul.mubr.f32.gmra.mrb[90].mxu1 %v3807_v10 }
 0x14e   : > { %1932 = vmatprep.mubr.f32.mxu1 %v3827_v25 }
 0x14f   : > { %1732 = vmatmul.mubr.f32.gmra.mrb[94].mxu0 %v3887_v14 }
 0x151   : > { %1934 = vmatmul.mubr.f32.gmra.mrb[92].mxu1 %v3836_v20 }
 0x152   : > { %1939 = vmatprep.mubr.f32.mxu1 %v3853_v3 }
 0x155   : > { %1941 = vmatmul.mubr.f32.gmra.mrb[94].mxu1 %v3887_v14 }
 0x160   : > { %v2254_v24 = vpop.f32.mrb[0].mxu0 }
 0x161   : > { %v2255_v18 = vpop.f32.mrb[1].mxu0 }
 0x162   : > { %v2256_v36 = vadd.f32 %v2255_v18, %v2254_v24 }
 0x166   : > { %v2257_v21 = vpop.f32.mrb[2].mxu0 }
 0x167   : > { %v2258_v43 = vpop.f32.mrb[3].mxu0 }
 0x168   : > { %v2259_v23 = vadd.f32 %v2258_v43, %v2257_v21 }
 0x16c   : > { %v2334_v27 = vpop.f32.mrb[0].mxu1  ;;  %v2260_v22 = vpop.f32.mrb[4].mxu0 }
 0x16d   : > { %v2335_v5 = vpop.f32.mrb[1].mxu1  ;;  %v2261_v10 = vpop.f32.mrb[5].mxu0 }
 0x16e   : > { %v2336_v32 = vadd.f32 %v2335_v5, %v2334_v27  ;;  %v2262_v42 = vadd.f32 %v2261_v10, %v2260_v22 }
 0x170   : > { %v4168_v25 = vadd.f32 %v2336_v32, %v2256_v36  ;;  %v2337_v35 = vpop.f32.mrb[2].mxu1 }
 0x171   : > { %v2338_v20 = vpop.f32.mrb[3].mxu1 }
 0x172   : > { %v2339_v46 = vadd.f32 %v2338_v20, %v2337_v35  ;;  %v2263_v3 = vpop.f32.mrb[6].mxu0 }
 0x173   : > { %v2264_v33 = vpop.f32.mrb[7].mxu0 }
 0x174   : > { %v4170_v14 = vadd.f32 %v2339_v46, %v2259_v23  ;;  %v2340_v31 = vpop.f32.mrb[4].mxu1  ;;  %v2265_v47 = vadd.f32 %v2264_v33, %v2263_v3 }
 0x175   : > { %v2341_v45 = vpop.f32.mrb[5].mxu1 }
 0x176   : > { %v2342_v19 = vadd.f32 %v2341_v45, %v2340_v31  ;;  %v2266_v1 = vpop.f32.mrb[8].mxu0 }
 0x177   : > { %v2267_v4 = vpop.f32.mrb[9].mxu0 }
 0x178   : > { %v4172_v15 = vadd.f32 %v2342_v19, %v2262_v42  ;;  %v2343_v54 = vpop.f32.mrb[6].mxu1  ;;  %v2268_v17 = vadd.f32 %v2267_v4, %v2266_v1 }
 0x179   : > { %v2344_v50 = vpop.f32.mrb[7].mxu1 }
 0x17a   : > { %v2345_v60 = vadd.f32 %v2344_v50, %v2343_v54  ;;  %v2269_v11 = vpop.f32.mrb[10].mxu0 }
 0x17b   : > { %v2270_v44 = vpop.f32.mrb[11].mxu0 }
 0x17c   : > { %v4174_v41 = vadd.f32 %v2345_v60, %v2265_v47  ;;  %v2346_v39 = vpop.f32.mrb[8].mxu1  ;;  %v2271_v37 = vadd.f32 %v2270_v44, %v2269_v11 }
 0x17d   : > { %v2347_v28 = vpop.f32.mrb[9].mxu1 }
 0x17e   : > { %v2348_v56 = vadd.f32 %v2347_v28, %v2346_v39  ;;  %v2272_v29 = vpop.f32.mrb[12].mxu0 }
 0x17f   : > { %v2273_v51 = vpop.f32.mrb[13].mxu0 }
 0x180   : > { %v4176_v62 = vadd.f32 %v2348_v56, %v2268_v17  ;;  %v2349_v63 = vpop.f32.mrb[10].mxu1  ;;  %v2274_v7 = vadd.f32 %v2273_v51, %v2272_v29 }
 0x181   : > { %v2350_v40 = vpop.f32.mrb[11].mxu1 }
 0x182   : > { %v2351_v26 = vadd.f32 %v2350_v40, %v2349_v63  ;;  %v2275_v49 = vpop.f32.mrb[14].mxu0 }
 0x183   : > { %v2276_v53 = vpop.f32.mrb[15].mxu0 }
 0x184   : > { %v4178_v2 = vadd.f32 %v2351_v26, %v2271_v37  ;;  %v2352_v16 = vpop.f32.mrb[12].mxu1  ;;  %v2277_v12 = vadd.f32 %v2276_v53, %v2275_v49 }
 0x185   : > { %v2353_v59 = vpop.f32.mrb[13].mxu1 }
 0x186   : > { %v2354_v0 = vadd.f32 %v2353_v59, %v2352_v16  ;;  %v2278_v8 = vpop.f32.mrb[16].mxu0 }
 0x187   : > { %v2279_v48 = vpop.f32.mrb[17].mxu0 }
 0x188   : > { %v4180_v34 = vadd.f32 %v2354_v0, %v2274_v7  ;;  %v2355_v6 = vpop.f32.mrb[14].mxu1  ;;  %v2280_v9 = vadd.f32 %v2279_v48, %v2278_v8 }
 0x189   : > { %v2356_v30 = vpop.f32.mrb[15].mxu1 }
 0x18a   : > { %v2357_v38 = vadd.f32 %v2356_v30, %v2355_v6  ;;  %v2281_v57 = vpop.f32.mrb[18].mxu0 }
 0x18b   : > { %v2282_v61 = vpop.f32.mrb[19].mxu0 }
 0x18c   : > { %v4182_v52 = vadd.f32 %v2357_v38, %v2277_v12  ;;  %v2358_v55 = vpop.f32.mrb[16].mxu1  ;;  %v2283_v13 = vadd.f32 %v2282_v61, %v2281_v57 }
 0x18d   : > { %v2359_v58 = vpop.f32.mrb[17].mxu1 }
 0x18e   : > { %v2360_v24 = vadd.f32 %v2359_v58, %v2358_v55  ;;  %v2284_v18 = vpop.f32.mrb[20].mxu0 }
 0x18f   : > { %v2285_v36 = vpop.f32.mrb[21].mxu0 }
 0x190   : > { %v4184_v21 = vadd.f32 %v2360_v24, %v2280_v9  ;;  %v2361_v43 = vpop.f32.mrb[18].mxu1  ;;  %v2286_v23 = vadd.f32 %v2285_v36, %v2284_v18 }
 0x191   : > { %v2362_v27 = vpop.f32.mrb[19].mxu1 }
 0x192   : > { %v2363_v5 = vadd.f32 %v2362_v27, %v2361_v43  ;;  %v2287_v32 = vpop.f32.mrb[22].mxu0 }
 0x193   : > { %v2288_v22 = vpop.f32.mrb[23].mxu0 }
 0x194   : > { %v4186_v10 = vadd.f32 %v2363_v5, %v2283_v13  ;;  %v2364_v35 = vpop.f32.mrb[20].mxu1  ;;  %v2289_v42 = vadd.f32 %v2288_v22, %v2287_v32 }
 0x195   : > { %v2365_v20 = vpop.f32.mrb[21].mxu1 }
 0x196   : > { %v2366_v46 = vadd.f32 %v2365_v20, %v2364_v35  ;;  %v2290_v3 = vpop.f32.mrb[24].mxu0 }
 0x197   : > { %v2291_v33 = vpop.f32.mrb[25].mxu0 }
 0x198   : > { %v4188_v31 = vadd.f32 %v2366_v46, %v2286_v23  ;;  %v2367_v47 = vpop.f32.mrb[22].mxu1  ;;  %v2292_v45 = vadd.f32 %v2291_v33, %v2290_v3 }
 0x199   : > { %v2368_v19 = vpop.f32.mrb[23].mxu1 }
 0x19a   : > { %v2369_v1 = vadd.f32 %v2368_v19, %v2367_v47  ;;  %v2293_v4 = vpop.f32.mrb[26].mxu0 }
 0x19b   : > { %v2294_v54 = vpop.f32.mrb[27].mxu0 }
 0x19c   : > { %v4190_v17 = vadd.f32 %v2369_v1, %v2289_v42  ;;  %v2370_v50 = vpop.f32.mrb[24].mxu1  ;;  %v2295_v60 = vadd.f32 %v2294_v54, %v2293_v4 }
 0x19d   : > { %v2371_v11 = vpop.f32.mrb[25].mxu1 }
 0x19e   : > { %v2372_v44 = vadd.f32 %v2371_v11, %v2370_v50  ;;  %v2296_v39 = vpop.f32.mrb[28].mxu0 }
 0x19f   : > { %v2297_v37 = vpop.f32.mrb[29].mxu0 }
 0x1a0   : > { %v4192_v28 = vadd.f32 %v2372_v44, %v2292_v45  ;;  %v2373_v56 = vpop.f32.mrb[26].mxu1  ;;  %v2298_v29 = vadd.f32 %v2297_v37, %v2296_v39 }
 0x1a1   : > { %v2374_v51 = vpop.f32.mrb[27].mxu1 }
 0x1a2   : > { %v2375_v63 = vadd.f32 %v2374_v51, %v2373_v56  ;;  %v2299_v7 = vpop.f32.mrb[30].mxu0 }
 0x1a3   : > { %v2300_v40 = vpop.f32.mrb[31].mxu0 }
 0x1a4   : > { %v4194_v26 = vadd.f32 %v2375_v63, %v2295_v60  ;;  %v2301_v49 = vadd.f32 %v2300_v40, %v2299_v7  ;;  %v2376_v53 = vpop.f32.mrb[28].mxu1 }
 0x1a5   : > { %v2377_v16 = vpop.f32.mrb[29].mxu1 }
 0x1a6   : > { %v2414_v12 = vpop.f32.mrb[32].mxu0  ;;  %v2378_v59 = vadd.f32 %v2377_v16, %v2376_v53 }
 0x1a7   : > { %v2415_v0 = vpop.f32.mrb[33].mxu0 }
 0x1a8   : > { %v4196_v8 = vadd.f32 %v2378_v59, %v2298_v29  ;;  %v2416_v48 = vadd.f32 %v2415_v0, %v2414_v12  ;;  %v2379_v6 = vpop.f32.mrb[30].mxu1 }
 0x1a9   : > { %v2380_v9 = vpop.f32.mrb[31].mxu1 }
 0x1aa   : > { %v1053_v30 = vadd.f32 %v2416_v48, %v4168_v25  ;;  %v2417_v38 = vpop.f32.mrb[34].mxu0  ;;  %v2381_v57 = vadd.f32 %v2380_v9, %v2379_v6 }
 0x1ab   : > { %v2418_v61 = vpop.f32.mrb[35].mxu0 }
 0x1ac   : > { %v4199_v55 = vadd.f32 %v2381_v57, %v2301_v49  ;;  %v2419_v13 = vadd.f32 %v2418_v61, %v2417_v38  ;;  %v2494_v58 = vpop.f32.mrb[32].mxu1 }
 0x1ad   : > { %v2495_v24 = vpop.f32.mrb[33].mxu1 }
 0x1ae   : > { %v1062_v18 = vadd.f32 %v2419_v13, %v4170_v14  ;;  %v2420_v36 = vpop.f32.mrb[36].mxu0  ;;  %v2496_v43 = vadd.f32 %v2495_v24, %v2494_v58 }
 0x1af   : > { %v2421_v23 = vpop.f32.mrb[37].mxu0 }
 0x1b0   : > { %v2422_v27 = vadd.f32 %v2421_v23, %v2420_v36  ;;  %v4202_v5 = vadd.f32 %v2496_v43, %v1053_v30  ;;  %v2497_v32 = vpop.f32.mrb[34].mxu1 }
 0x1b1   : > { %v2498_v22 = vpop.f32.mrb[35].mxu1 }
 0x1b2   : > { %v1071_v25 = vadd.f32 %v2422_v27, %v4172_v15  ;;  %v2423_v35 = vpop.f32.mrb[38].mxu0  ;;  %v2499_v42 = vadd.f32 %v2498_v22, %v2497_v32 }
 0x1b3   : > { %v2424_v20 = vpop.f32.mrb[39].mxu0 }
 0x1b4   : > { %v2425_v46 = vadd.f32 %v2424_v20, %v2423_v35  ;;  %v4205_v3 = vadd.f32 %v2499_v42, %v1062_v18  ;;  %v2500_v33 = vpop.f32.mrb[36].mxu1 }
 0x1b5   : > { %v2501_v47 = vpop.f32.mrb[37].mxu1 }
 0x1b6   : > { %v1080_v14 = vadd.f32 %v2425_v46, %v4174_v41  ;;  %v2426_v45 = vpop.f32.mrb[40].mxu0  ;;  %v2502_v19 = vadd.f32 %v2501_v47, %v2500_v33 }
 0x1b7   : > { %v2427_v1 = vpop.f32.mrb[41].mxu0 }
 0x1b8   : > { %v2428_v4 = vadd.f32 %v2427_v1, %v2426_v45  ;;  %v4208_v54 = vadd.f32 %v2502_v19, %v1071_v25  ;;  %v2503_v50 = vpop.f32.mrb[38].mxu1 }
 0x1b9   : > { %v2504_v60 = vpop.f32.mrb[39].mxu1 }
 0x1ba   : > { %v1089_v15 = vadd.f32 %v2428_v4, %v4176_v62  ;;  %v2429_v11 = vpop.f32.mrb[42].mxu0  ;;  %v2505_v44 = vadd.f32 %v2504_v60, %v2503_v50 }
 0x1bb   : > { %v2430_v39 = vpop.f32.mrb[43].mxu0 }
 0x1bc   : > { %v2431_v37 = vadd.f32 %v2430_v39, %v2429_v11  ;;  %v4211_v56 = vadd.f32 %v2505_v44, %v1080_v14  ;;  %v2506_v29 = vpop.f32.mrb[40].mxu1 }
 0x1bd   : > { %v2507_v51 = vpop.f32.mrb[41].mxu1 }
 0x1be   : > { %v1098_v41 = vadd.f32 %v2431_v37, %v4178_v2  ;;  %v2432_v63 = vpop.f32.mrb[44].mxu0  ;;  %v2508_v7 = vadd.f32 %v2507_v51, %v2506_v29 }
 0x1bf   : > { %v2433_v40 = vpop.f32.mrb[45].mxu0 }
 0x1c0   : > { %v2434_v49 = vadd.f32 %v2433_v40, %v2432_v63  ;;  %v4214_v53 = vadd.f32 %v2508_v7, %v1089_v15  ;;  %v2509_v16 = vpop.f32.mrb[42].mxu1 }
 0x1c1   : > { %v2510_v12 = vpop.f32.mrb[43].mxu1 }
 0x1c2   : > { %v1107_v62 = vadd.f32 %v2434_v49, %v4180_v34  ;;  %v2435_v59 = vpop.f32.mrb[46].mxu0  ;;  %v2511_v0 = vadd.f32 %v2510_v12, %v2509_v16 }
 0x1c3   : > { %v2436_v48 = vpop.f32.mrb[47].mxu0 }
 0x1c4   : > { %v2437_v6 = vadd.f32 %v2436_v48, %v2435_v59  ;;  %v4217_v9 = vadd.f32 %v2511_v0, %v1098_v41  ;;  %v2512_v30 = vpop.f32.mrb[44].mxu1 }
 0x1c5   : > { %v2513_v38 = vpop.f32.mrb[45].mxu1 }
 0x1c6   : > { %v1116_v2 = vadd.f32 %v2437_v6, %v4182_v52  ;;  %v2438_v57 = vpop.f32.mrb[48].mxu0  ;;  %v2514_v61 = vadd.f32 %v2513_v38, %v2512_v30 }
 0x1c7   : > { %v2439_v13 = vpop.f32.mrb[49].mxu0 }
 0x1c8   : > { %v2440_v58 = vadd.f32 %v2439_v13, %v2438_v57  ;;  %v4220_v24 = vadd.f32 %v2514_v61, %v1107_v62  ;;  %v2515_v18 = vpop.f32.mrb[46].mxu1 }
 0x1c9   : > { %v2516_v36 = vpop.f32.mrb[47].mxu1 }
 0x1ca   : > { %v1125_v34 = vadd.f32 %v2440_v58, %v4184_v21  ;;  %v2441_v43 = vpop.f32.mrb[50].mxu0  ;;  %v2517_v23 = vadd.f32 %v2516_v36, %v2515_v18 }
 0x1cb   : > { %v2442_v27 = vpop.f32.mrb[51].mxu0 }
 0x1cc   : > { %v2443_v32 = vadd.f32 %v2442_v27, %v2441_v43  ;;  %v4223_v22 = vadd.f32 %v2517_v23, %v1116_v2  ;;  %v2518_v25 = vpop.f32.mrb[48].mxu1 }
 0x1cd   : > { %v2519_v35 = vpop.f32.mrb[49].mxu1 }
 0x1ce   : > { %v1134_v52 = vadd.f32 %v2443_v32, %v4186_v10  ;;  %v2444_v42 = vpop.f32.mrb[52].mxu0  ;;  %v2520_v20 = vadd.f32 %v2519_v35, %v2518_v25 }
 0x1cf   : > { %v2445_v46 = vpop.f32.mrb[53].mxu0 }
 0x1d0   : > { %v2446_v33 = vadd.f32 %v2445_v46, %v2444_v42  ;;  %v4226_v47 = vadd.f32 %v2520_v20, %v1125_v34  ;;  %v2521_v14 = vpop.f32.mrb[50].mxu1 }
 0x1d1   : > { %v2522_v45 = vpop.f32.mrb[51].mxu1 }
 0x1d2   : > { %v1143_v21 = vadd.f32 %v2446_v33, %v4188_v31  ;;  %v2447_v19 = vpop.f32.mrb[54].mxu0  ;;  %v2523_v1 = vadd.f32 %v2522_v45, %v2521_v14 }
 0x1d3   : > { %v2448_v4 = vpop.f32.mrb[55].mxu0 }
 0x1d4   : > { %v2449_v50 = vadd.f32 %v2448_v4, %v2447_v19  ;;  %v4229_v60 = vadd.f32 %v2523_v1, %v1134_v52  ;;  %v2524_v15 = vpop.f32.mrb[52].mxu1 }
 0x1d5   : > { %v2525_v11 = vpop.f32.mrb[53].mxu1 }
 0x1d6   : > { %v1152_v10 = vadd.f32 %v2449_v50, %v4190_v17  ;;  %v2450_v44 = vpop.f32.mrb[56].mxu0  ;;  %v2526_v39 = vadd.f32 %v2525_v11, %v2524_v15 }
 0x1d7   : > { %v2451_v37 = vpop.f32.mrb[57].mxu0 }
 0x1d8   : > { %v2452_v29 = vadd.f32 %v2451_v37, %v2450_v44  ;;  %v4232_v51 = vadd.f32 %v2526_v39, %v1143_v21  ;;  %v2527_v41 = vpop.f32.mrb[54].mxu1 }
 0x1d9   : > { %v2528_v63 = vpop.f32.mrb[55].mxu1 }
 0x1da   : > { %v1161_v31 = vadd.f32 %v2452_v29, %v4192_v28  ;;  %v2453_v7 = vpop.f32.mrb[58].mxu0  ;;  %v2529_v40 = vadd.f32 %v2528_v63, %v2527_v41 }
 0x1db   : > { %v2454_v49 = vpop.f32.mrb[59].mxu0 }
 0x1dc   : > { %v2455_v16 = vadd.f32 %v2454_v49, %v2453_v7  ;;  %v4235_v12 = vadd.f32 %v2529_v40, %v1152_v10  ;;  %v2530_v62 = vpop.f32.mrb[56].mxu1 }
 0x1dd   : > { %v2531_v59 = vpop.f32.mrb[57].mxu1 }
 0x1de   : > { %v1170_v17 = vadd.f32 %v2455_v16, %v4194_v26  ;;  %v2456_v0 = vpop.f32.mrb[60].mxu0  ;;  %v2532_v48 = vadd.f32 %v2531_v59, %v2530_v62 }
 0x1df   : > { %v2457_v6 = vpop.f32.mrb[61].mxu0 }
 0x1e0   : > { %v2458_v30 = vadd.f32 %v2457_v6, %v2456_v0  ;;  %v4238_v38 = vadd.f32 %v2532_v48, %v1161_v31  ;;  %v2533_v2 = vpop.f32.mrb[58].mxu1 }
 0x1e1   : > { %v2534_v57 = vpop.f32.mrb[59].mxu1 }
 0x1e2   : > { %v1179_v28 = vadd.f32 %v2458_v30, %v4196_v8  ;;  %v2459_v61 = vpop.f32.mrb[62].mxu0  ;;  %v2535_v13 = vadd.f32 %v2534_v57, %v2533_v2 }
 0x1e3   : > { %v2460_v58 = vpop.f32.mrb[63].mxu0 }
 0x1e4   : > { %v2461_v18 = vadd.f32 %v2460_v58, %v2459_v61  ;;  %v4241_v36 = vadd.f32 %v2535_v13, %v1170_v17  ;;  %v2536_v34 = vpop.f32.mrb[60].mxu1 }
 0x1e5   : > { %v2537_v43 = vpop.f32.mrb[61].mxu1 }
 0x1e6   : > { %v1188_v26 = vadd.f32 %v2461_v18, %v4199_v55  ;;  %v2574_v23 = vpop.f32.mrb[64].mxu0  ;;  %v2538_v27 = vadd.f32 %v2537_v43, %v2536_v34 }
 0x1e7   : > { %v2575_v32 = vpop.f32.mrb[65].mxu0 }
 0x1e8   : > { %v4244_v25 = vadd.f32 %v2538_v27, %v1179_v28  ;;  %v2576_v35 = vadd.f32 %v2575_v32, %v2574_v23  ;;  %v2539_v52 = vpop.f32.mrb[62].mxu1 }
 0x1e9   : > { %v2540_v42 = vpop.f32.mrb[63].mxu1 }
 0x1ea   : > { %v1629_v8 = vadd.f32 %v2576_v35, %v4202_v5  ;;  %v2577_v20 = vpop.f32.mrb[66].mxu0  ;;  %v2541_v46 = vadd.f32 %v2540_v42, %v2539_v52 }
 0x1eb   : > { %v2578_v33 = vpop.f32.mrb[67].mxu0 }
 0x1ec   : > { %v4247_v14 = vadd.f32 %v2541_v46, %v1188_v26  ;;  %v2579_v45 = vadd.f32 %v2578_v33, %v2577_v20  ;;  %v2654_v21 = vpop.f32.mrb[64].mxu1 }
 0x1ed   : > { %v2655_v19 = vpop.f32.mrb[65].mxu1 }
 0x1ee   : > { %v1636_v55 = vadd.f32 %v2579_v45, %v4205_v3  ;;  %v2580_v1 = vpop.f32.mrb[68].mxu0  ;;  %v2656_v4 = vadd.f32 %v2655_v19, %v2654_v21 }
 0x1ef   : > { %v2581_v50 = vpop.f32.mrb[69].mxu0 }
 0x1f0   : > { %v2582_v15 = vadd.f32 %v2581_v50, %v2580_v1  ;;  %v1838_v11 = vadd.f32 %v2656_v4, %v1629_v8  ;;  %v2657_v10 = vpop.f32.mrb[66].mxu1 }
 0x1f1   : > { %v2658_v44 = vpop.f32.mrb[67].mxu1 }
 0x1f2   : > { %v1643_v5 = vadd.f32 %v2582_v15, %v4208_v54  ;;  %v2583_v39 = vpop.f32.mrb[70].mxu0  ;;  %v2659_v37 = vadd.f32 %v2658_v44, %v2657_v10 }
 0x1f3   : > { %v2584_v29 = vpop.f32.mrb[71].mxu0 }
 0x1f4   : > { %v2585_v41 = vadd.f32 %v2584_v29, %v2583_v39  ;;  %v1845_v63 = vadd.f32 %v2659_v37, %v1636_v55  ;;  %v2660_v31 = vpop.f32.mrb[68].mxu1 }
 0x1f5   : > { %v2661_v7 = vpop.f32.mrb[69].mxu1 }
 0x1f6   : > { %v1650_v40 = vadd.f32 %v2585_v41, %v4211_v56  ;;  %v2178_v3 = vpack.c.bf16 %v1845_v63, %v1838_v11  ;;  %v2586_v49 = vpop.f32.mrb[72].mxu0  ;;  %v2662_v16 = vadd.f32 %v2661_v7, %v2660_v31 }
 0x1f7   : > { %v2587_v62 = vpop.f32.mrb[73].mxu0 }
 0x1f8   : > { %2179 = vst [vmem:[%s4253_s17] sm:$0xff] %v2178_v3   ;;  %v2588_v59 = vadd.f32 %v2587_v62, %v2586_v49  ;;  %v1852_v54 = vadd.f32 %v2662_v16, %v1643_v5  ;;  %v2663_v17 = vpop.f32.mrb[70].mxu1 }
 0x1f9   : > { %v2664_v0 = vpop.f32.mrb[71].mxu1 }
 0x1fa   : > { %v1657_v48 = vadd.f32 %v2588_v59, %v4214_v53  ;;  %v2589_v6 = vpop.f32.mrb[74].mxu0  ;;  %v2665_v30 = vadd.f32 %v2664_v0, %v2663_v17 }
 0x1fb   : > { %v2590_v2 = vpop.f32.mrb[75].mxu0 }
 0x1fc   : > { %v2591_v57 = vadd.f32 %v2590_v2, %v2589_v6  ;;  %v1859_v56 = vadd.f32 %v2665_v30, %v1650_v40  ;;  %v2666_v28 = vpop.f32.mrb[72].mxu1 }
 0x1fd   : > { %v2667_v61 = vpop.f32.mrb[73].mxu1 }
 0x1fe   : > { %v1664_v13 = vadd.f32 %v2591_v57, %v4217_v9  ;;  %v2183_v58 = vpack.c.bf16 %v1859_v56, %v1852_v54  ;;  %v2592_v18 = vpop.f32.mrb[76].mxu0  ;;  %v2668_v34 = vadd.f32 %v2667_v61, %v2666_v28 }
 0x1ff   : > { %v2593_v43 = vpop.f32.mrb[77].mxu0 }
 0x200   : > { %2215 = vst [vmem:[%s4253_s17 + $0x8] sm:$0xff] %v2183_v58   ;;  %v2594_v26 = vadd.f32 %v2593_v43, %v2592_v18  ;;  %v1866_v23 = vadd.f32 %v2668_v34, %v1657_v48  ;;  %v2669_v27 = vpop.f32.mrb[74].mxu1 }
 0x201   : > { %v2670_v32 = vpop.f32.mrb[75].mxu1 }
 0x202   : > { %v1671_v53 = vadd.f32 %v2594_v26, %v4220_v24  ;;  %v2595_v35 = vpop.f32.mrb[78].mxu0  ;;  %v2671_v52 = vadd.f32 %v2670_v32, %v2669_v27 }
 0x203   : > { %v2596_v42 = vpop.f32.mrb[79].mxu0 }
 0x204   : > { %v2597_v8 = vadd.f32 %v2596_v42, %v2595_v35  ;;  %v1873_v20 = vadd.f32 %v2671_v52, %v1664_v13  ;;  %v2672_v46 = vpop.f32.mrb[76].mxu1 }
 0x205   : > { %v2673_v33 = vpop.f32.mrb[77].mxu1 }
 0x206   : > { %v1678_v9 = vadd.f32 %v2597_v8, %v4223_v22  ;;  %v2188_v45 = vpack.c.bf16 %v1873_v20, %v1866_v23  ;;  %v2598_v21 = vpop.f32.mrb[80].mxu0  ;;  %v2674_v19 = vadd.f32 %v2673_v33, %v2672_v46 }
 0x207   : > { %v2599_v55 = vpop.f32.mrb[81].mxu0 }
 0x208   : > { %2216 = vst [vmem:[%s4253_s17 + $0x10] sm:$0xff] %v2188_v45   ;;  %v2600_v1 = vadd.f32 %v2599_v55, %v2598_v21  ;;  %v1880_v4 = vadd.f32 %v2674_v19, %v1671_v53  ;;  %v2675_v50 = vpop.f32.mrb[78].mxu1 }
 0x209   : > { %v2676_v15 = vpop.f32.mrb[79].mxu1 }
 0x20a   : > { %v1685_v24 = vadd.f32 %v2600_v1, %v4226_v47  ;;  %v2601_v11 = vpop.f32.mrb[82].mxu0  ;;  %v2677_v10 = vadd.f32 %v2676_v15, %v2675_v50 }
 0x20b   : > { %v2602_v44 = vpop.f32.mrb[83].mxu0 }
 0x20c   : > { %v2603_v5 = vadd.f32 %v2602_v44, %v2601_v11  ;;  %v1887_v39 = vadd.f32 %v2677_v10, %v1678_v9  ;;  %v2678_v37 = vpop.f32.mrb[80].mxu1 }
 0x20d   : > { %v2679_v29 = vpop.f32.mrb[81].mxu1 }
 0x20e   : > { %v1692_v22 = vadd.f32 %v2603_v5, %v4229_v60  ;;  %v2193_v41 = vpack.c.bf16 %v1887_v39, %v1880_v4  ;;  %v2604_v63 = vpop.f32.mrb[84].mxu0  ;;  %v2680_v31 = vadd.f32 %v2679_v29, %v2678_v37 }
 0x20f   : > { %v2605_v7 = vpop.f32.mrb[85].mxu0 }
 0x210   : > { %2217 = vst [vmem:[%s4253_s17 + $0x18] sm:$0xff] %v2193_v41   ;;  %v2606_v40 = vadd.f32 %v2605_v7, %v2604_v63  ;;  %v1894_v3 = vadd.f32 %v2680_v31, %v1685_v24  ;;  %v2681_v49 = vpop.f32.mrb[82].mxu1 }
 0x211   : > { %v2682_v16 = vpop.f32.mrb[83].mxu1 }
 0x212   : > { %v1699_v47 = vadd.f32 %v2606_v40, %v4232_v51  ;;  %v2607_v62 = vpop.f32.mrb[86].mxu0  ;;  %v2683_v59 = vadd.f32 %v2682_v16, %v2681_v49 }
 0x213   : > { %v2608_v54 = vpop.f32.mrb[87].mxu0 }
 0x214   : > { %v2609_v17 = vadd.f32 %v2608_v54, %v2607_v62  ;;  %v1901_v0 = vadd.f32 %v2683_v59, %v1692_v22  ;;  %v2684_v48 = vpop.f32.mrb[84].mxu1 }
 0x215   : > { %v2685_v6 = vpop.f32.mrb[85].mxu1 }
 0x216   : > { %v1706_v60 = vadd.f32 %v2609_v17, %v4235_v12  ;;  %v2198_v30 = vpack.c.bf16 %v1901_v0, %v1894_v3  ;;  %v2610_v2 = vpop.f32.mrb[88].mxu0  ;;  %v2686_v57 = vadd.f32 %v2685_v6, %v2684_v48 }
 0x217   : > { %v2611_v56 = vpop.f32.mrb[89].mxu0 }
 0x218   : > { %2218 = vst [vmem:[%s4253_s17 + $0x20] sm:$0xff] %v2198_v30   ;;  %v2612_v28 = vadd.f32 %v2611_v56, %v2610_v2  ;;  %v1908_v61 = vadd.f32 %v2686_v57, %v1699_v47  ;;  %v2687_v13 = vpop.f32.mrb[86].mxu1 }
 0x219   : > { %v2688_v58 = vpop.f32.mrb[87].mxu1 }
 0x21a   : > { %v1713_v51 = vadd.f32 %v2612_v28, %v4238_v38  ;;  %v2613_v18 = vpop.f32.mrb[90].mxu0  ;;  %v2689_v34 = vadd.f32 %v2688_v58, %v2687_v13 }
 0x21b   : > { %v2614_v43 = vpop.f32.mrb[91].mxu0 }
 0x21c   : > { %v2615_v26 = vadd.f32 %v2614_v43, %v2613_v18  ;;  %v1915_v23 = vadd.f32 %v2689_v34, %v1706_v60  ;;  %v2690_v27 = vpop.f32.mrb[88].mxu1 }
 0x21d   : > { %v2691_v32 = vpop.f32.mrb[89].mxu1 }
 0x21e   : > { %v1720_v12 = vadd.f32 %v2615_v26, %v4241_v36  ;;  %v2203_v53 = vpack.c.bf16 %v1915_v23, %v1908_v61  ;;  %v2616_v35 = vpop.f32.mrb[92].mxu0  ;;  %v2692_v52 = vadd.f32 %v2691_v32, %v2690_v27 }
 0x21f   : > { %v2617_v42 = vpop.f32.mrb[93].mxu0 }
 0x220   : > { %2219 = vst [vmem:[%s4253_s17 + $0x28] sm:$0xff] %v2203_v53   ;;  %v2618_v8 = vadd.f32 %v2617_v42, %v2616_v35  ;;  %v1922_v20 = vadd.f32 %v2692_v52, %v1713_v51  ;;  %v2693_v46 = vpop.f32.mrb[90].mxu1 }
 0x221   : > { %v2694_v33 = vpop.f32.mrb[91].mxu1 }
 0x222   : > { %v1727_v38 = vadd.f32 %v2618_v8, %v4244_v25  ;;  %v2619_v9 = vpop.f32.mrb[94].mxu0  ;;  %v2695_v45 = vadd.f32 %v2694_v33, %v2693_v46 }
 0x223   : > { %v2620_v21 = vpop.f32.mrb[95].mxu0 }
 0x224   : > { %v2621_v19 = vadd.f32 %v2620_v21, %v2619_v9  ;;  %v1929_v55 = vadd.f32 %v2695_v45, %v1720_v12  ;;  %v2696_v36 = vpop.f32.mrb[92].mxu1 }
 0x225   : > { %v2697_v1 = vpop.f32.mrb[93].mxu1 }
 0x226   : > { %v1734_v4 = vadd.f32 %v2621_v19, %v4247_v14  ;;  %v2208_v50 = vpack.c.bf16 %v1929_v55, %v1922_v20  ;;  %v2698_v15 = vadd.f32 %v2697_v1, %v2696_v36 }
 0x228   : > { %2220 = vst [vmem:[%s4253_s17 + $0x30] sm:$0xff] %v2208_v50   ;;  %v1936_v24 = vadd.f32 %v2698_v15, %v1727_v38  ;;  %v2699_v11 = vpop.f32.mrb[94].mxu1 }
 0x229   : > { %v2700_v25 = vpop.f32.mrb[95].mxu1 }
 0x22a   : > { %v2701_v10 = vadd.f32 %v2700_v25, %v2699_v11 }
 0x22c   : > { %v1943_v44 = vadd.f32 %v2701_v10, %v1734_v4 }
 0x22e   : > { %v2213_v14 = vpack.c.bf16 %v1943_v44, %v1936_v24 }
 0x230   : > { %2221 = vst [vmem:[%s4253_s17 + $0x38] sm:$0xff] %v2213_v14  }
 0x231   : > { %3028 = shalt.err (!%p3025_p7)
}
 0x232   : > { %s3029_s24 = scalar_lea.hbm %s4279_s4, 1024  ;;  %s3033_s26 = scalar_lea.hbm %s4328_s2, 2048 }
 0x233   : > { %p3030_p9 = scmp.ne.s32.totalorder %s4279_s4, %s3029_s24  ;;  %p3034_p5 = scmp.lt.u32.totalorder %s4279_s4, %s4328_s2 }
 0x234   : > { %p3035_p11 = scmp.lt.u32.totalorder %s3033_s26, %s3029_s24  ;;  %p3037_p4 = scmp.lt.u32.totalorder %s3029_s24, %s4279_s4 }
 0x235   : > { %p3031_p2 = pnand %p3030_p9, %p3202_p12 }
 0x236   : > { %p3036_p1 = por %p3035_p11, %p3034_p5 }
 0x237   : > { %p3032_p0 = pneg %p3031_p2 }
 0x238   : > { %p3038_p6 = por %p3037_p4, %p3036_p1 }
 0x23a   : > { %p3039_p8 = pnand %p3038_p6, %p3032_p0 }
 0x23c   : > { %3042 = shalt.err (!%p3039_p8)
}
 0x23d   : > { %s3094_s3 = smov 64   ;;  %s3095_s15 = smov 4  }
 0x23e   : > { %2900 = dma.vmem_to_hbm [thread:$0]  (%p3202_p12), %s4281_s22, 1024, %s4279_s4, %s2027_s5, %s3094_s3, %s3094_s3, %s3095_s15  }
 0x23f PF: > { %s2055_s17 = sand.u32 1, %s3073_s9   ;;  %p4719_p10 = scmp.ne.s32.totalorder %s4490_s16, 0 }
 0x240   : > { %p4720_p13 = scmp.ge.s32.totalorder %s3085_s12, 2  ;;  %s2056_s27 = scalar_lea.sflag [#allocation4], %s2055_s17 }
 0x242   : > { %p2911_p3 = pnand %p4720_p13, %p4719_p10 }
 0x244   : > { %3068 = dma.done.wait (!%p2911_p3), %s2056_s27, 1024  }
 0x245   : > { %3070 = vsyncadd (!%p2911_p3), %s2056_s27, 4294966272  ;;  %p16_p7 = scmp.ge.s32.totalorder %s3167_s21, 4   ;;  %s4721_s9 = smov %s3077_s10 }
 0x246   : > { %s4722_s10 = smov %s3081_s11  ;;  %s4723_s11 = smov %s3198_s8 }
 0x247   : > { %s4724_s12 = smov %s3167_s21  ;;  %18 = sbr.rel (!%p16_p7) target bundleno = 6 (0x6), region = 77 }
 0x24e   :  { %2061 = vsyncpa [#allocation3], 1 }
 0x24f   :  { %2063 = vsyncpa [#allocation3 + $0x1], 1 }
 0x250   :  { %2064 = vsyncpa [#allocation6], 1 }
 0x251   :  { %2065 = vsyncpa [#allocation4], 1 }
 0x252   :  { %2067 = vsyncpa [#allocation4 + $0x1], 1 }

</bundles_post_ra>
